<compile_context>
chip_gen: v6e
topology: v6e:2x2x1
jax: 0.10.0
libtpu: 0.0.40
codegen_flags: <defaults>
</compile_context>

<pallas_src>
import math

import jax
import jax.numpy as jnp
from jax.experimental import pallas as pl
from jax.experimental.pallas import tpu as pltpu

# ---------------- configuration (small, consistent with the module) ---------
HIDDEN = 32          # transformer.d_model (must be divisible by 32 for GroupNorm)
NUM_CLASSES = 4
NUM_QUERIES = 8
NUM_DEC_LAYERS = 6   # so ref_pts_all[5] exists, as in the reference code
CIN = 4              # backbone.num_channels[0]
H = W = 16
BATCH = 1            # _forward_single_image always sees a single frame
GN_GROUPS = 32
GN_EPS = 1e-5
INV_SIG_EPS = 1e-5
LANES = 128          # TPU lane width; head output slab is lane-dense


# ---------------------------------------------------------------------------
# Fused kernel: input_proj (1x1 conv + GroupNorm(32, D)) + prediction heads
# over all decoder layers.  One grid step; everything resident in VMEM.
#   feat rows : (H*W, Cin) channels-last
#   hs rows   : (L*Q, D)
#   outputs   : srcs0 (H*W, D)  and  packed slab (L*Q, 128)
#               slab lanes [0, 4)   = sigmoid box coords
#               slab lanes [D, D+C) = raw class logits
# ---------------------------------------------------------------------------
def _motr_fused_kernel(feat_ref, pw_ref, pb_ref, gamma_ref, beta_ref,
                       h_ref, refp_ref, w1_ref, b1_ref, w2_ref, b2_ref,
                       w3_ref, b3_ref,
                       srcs_ref, slab_ref):
    # ---- input_proj: 1x1 conv + GroupNorm(32, D), group size D//32 == 1 ----
    x = feat_ref[...]                                                  # (HW, Cin)
    y = jnp.dot(x, pw_ref[...], preferred_element_type=jnp.float32) + pb_ref[...]
    # per-channel spatial statistics (group size 1 -> exact)
    # TODO(synk): general group size > 1 would pool channel stats per group.
    mean = jnp.mean(y, axis=0, keepdims=True)                          # (1, D)
    sq = jnp.mean(y * y, axis=0, keepdims=True)                        # (1, D)
    var = jnp.maximum(sq - mean * mean, 0.0)                           # clamp >= 0
    inv_std = jax.lax.rsqrt(var + GN_EPS)
    srcs_ref[...] = (y - mean) * inv_std * gamma_ref[...] + beta_ref[...]

    # ---- prediction heads over all L*Q rows ----
    h = h_ref[...]                                                     # (R, D)
    D = h.shape[-1]

    # fused [mlp_w1 | cls_w] (zero-padded to 128 lanes):
    #   lanes [0, D)     : bbox-MLP hidden (pre-relu)
    #   lanes [D, D+C)   : class logits
    #   lanes [D+C, 128) : exact zeros
    y1 = jnp.dot(h, w1_ref[...], preferred_element_type=jnp.float32) + b1_ref[...]
    xh = jnp.maximum(y1[:, :D], 0.0)
    xh = jnp.maximum(jnp.dot(xh, w2_ref[...], preferred_element_type=jnp.float32)
                     + b2_ref[...], 0.0)
    # bbox layer 3, zero-padded to 128 lanes: box pre-activations in lanes [0, 4)
    t = jnp.dot(xh, w3_ref[...], preferred_element_type=jnp.float32) + b3_ref[...]

    # inverse_sigmoid(reference): refp is pre-padded with 0.5 outside lanes
    # [0, 2), so inv == 0 there and only tmp[..., :2] receives the add.
    r = jnp.clip(refp_ref[...], 0.0, 1.0)
    inv = jnp.log(jnp.maximum(r, INV_SIG_EPS) / jnp.maximum(1.0 - r, INV_SIG_EPS))
    coords = jax.nn.sigmoid(t + inv)                                   # (R, 128)

    # lane-dense packed store: [0,4)=coords, [D,D+C)=logits, rest zeros.
    lane = jax.lax.broadcasted_iota(jnp.int32, coords.shape, 1)
    slab_ref[...] = jnp.where(lane < 4, coords, jnp.where(lane < D, 0.0, y1))


def pack_head_params(params):
    """One-time fusion / lane-padding of the head weights (not per frame)."""
    D, C = HIDDEN, NUM_CLASSES
    assert D + C <= LANES
    w1p = jnp.zeros((D, LANES), jnp.float32)
    w1p = w1p.at[:, :D].set(params["mlp_w1"]).at[:, D:D + C].set(params["cls_w"])
    b1p = jnp.zeros((LANES,), jnp.float32)
    b1p = b1p.at[:D].set(params["mlp_b1"]).at[D:D + C].set(params["cls_b"])
    w3p = jnp.zeros((D, LANES), jnp.float32).at[:, :4].set(params["mlp_w3"])
    b3p = jnp.zeros((LANES,), jnp.float32).at[:4].set(params["mlp_b3"])
    return dict(w1p=w1p, b1p=b1p[None, :],
                w2=params["mlp_w2"], b2=params["mlp_b2"][None, :],
                w3p=w3p, b3p=b3p[None, :])


def motr_fused(feat_rows, params, hp, hs_flat, refp):
    """Single pallas_call covering input_proj + all prediction heads.

    feat_rows: (H*W, Cin) channels-last;  hs_flat: (L*Q, D);
    refp: (L*Q, 128) lane-padded references (fill = 0.5).
    Returns (srcs0 (H*W, D), slab (L*Q, 128)).
    """
    HW, Cin = feat_rows.shape
    D = params["proj_w"].shape[1]
    R = hs_flat.shape[0]

    def full(shape):
        # every block equals the full array -> no (8,128) divisibility issue
        return pl.BlockSpec(shape, lambda i: (0, 0))

    return pl.pallas_call(
        _motr_fused_kernel,
        out_shape=(jax.ShapeDtypeStruct((HW, D), jnp.float32),
                   jax.ShapeDtypeStruct((R, LANES), jnp.float32)),
        grid=(1,),
        in_specs=[
            full((HW, Cin)),                       # feature rows
            full((Cin, D)), full((1, D)),          # proj w, b
            full((1, D)), full((1, D)),            # gn gamma, beta
            full((R, D)), full((R, LANES)),        # hs rows, padded references
            full((D, LANES)), full((1, LANES)),    # fused [mlp_w1 | cls_w], bias
            full((D, D)), full((1, D)),            # mlp layer 2
            full((D, LANES)), full((1, LANES)),    # mlp layer 3 (lane-padded)
        ],
        out_specs=(full((HW, D)), full((R, LANES))),
        compiler_params=pltpu.CompilerParams(dimension_semantics=("arbitrary",)),
    )(feat_rows, params["proj_w"], params["proj_b"][None, :],
      params["gn_gamma"][None, :], params["gn_beta"][None, :],
      hs_flat, refp,
      hp["w1p"], hp["b1p"], hp["w2"], hp["b2"], hp["w3p"], hp["b3p"])


# ---------------------------------------------------------------------------
# Parameter init (matching the shapes / init rules of MOTR.__init__)
# ---------------------------------------------------------------------------
def init_params(key):
    ks = jax.random.split(key, 12)

    def uni(k, shape, bound):
        return jax.random.uniform(k, shape, jnp.float32, -bound, bound)

    # input_proj: Conv2d(Cin, D, 1) with xavier_uniform(gain=1), bias 0;
    # GroupNorm(32, D) default affine (gamma=1, beta=0).
    xavier = math.sqrt(6.0 / (CIN + HIDDEN))
    proj_w = uni(ks[0], (CIN, HIDDEN), xavier)
    proj_b = jnp.zeros((HIDDEN,), jnp.float32)
    gn_gamma = jnp.ones((HIDDEN,), jnp.float32)
    gn_beta = jnp.zeros((HIDDEN,), jnp.float32)

    # class_embed: Linear(D, num_classes), bias = -log((1-p)/p), p = 0.01
    bias_value = -math.log((1.0 - 0.01) / 0.01)
    cls_w = uni(ks[1], (HIDDEN, NUM_CLASSES), 1.0 / math.sqrt(HIDDEN))
    cls_b = jnp.full((NUM_CLASSES,), bias_value, jnp.float32)

    # bbox_embed: MLP(D, D, 4, 3); last layer weight=0, bias=[0,0,-2,-2]
    mlp_w1 = uni(ks[2], (HIDDEN, HIDDEN), 1.0 / math.sqrt(HIDDEN))
    mlp_b1 = uni(ks[3], (HIDDEN,), 1.0 / math.sqrt(HIDDEN))
    mlp_w2 = uni(ks[4], (HIDDEN, HIDDEN), 1.0 / math.sqrt(HIDDEN))
    mlp_b2 = uni(ks[5], (HIDDEN,), 1.0 / math.sqrt(HIDDEN))
    mlp_w3 = jnp.zeros((HIDDEN, 4), jnp.float32)
    mlp_b3 = jnp.array([0.0, 0.0, -2.0, -2.0], jnp.float32)

    # query_embed: nn.Embedding(num_queries, 2*D) (kept for completeness)
    query_embed = jax.random.normal(ks[6], (NUM_QUERIES, 2 * HIDDEN), jnp.float32)

    return dict(proj_w=proj_w, proj_b=proj_b, gn_gamma=gn_gamma, gn_beta=gn_beta,
                cls_w=cls_w, cls_b=cls_b,
                mlp_w1=mlp_w1, mlp_b1=mlp_b1, mlp_w2=mlp_w2, mlp_b2=mlp_b2,
                mlp_w3=mlp_w3, mlp_b3=mlp_b3, query_embed=query_embed)


# ---------------------------------------------------------------------------
# MOTR head forward (inference path of _forward_single_image, minus the
# external backbone / transformer / tracker bookkeeping).
# ---------------------------------------------------------------------------
def motr_head_forward(params, head_packed, feat_nhwc, hs, init_reference,
                      inter_references):
    N, Hh, Ww, Cin = feat_nhwc.shape
    HW = Hh * Ww
    assert N == 1, "single-frame forward path"
    assert HIDDEN // GN_GROUPS == 1, "kernel specialized for group size 1"
    feat_rows = feat_nhwc.reshape(HW, Cin)

    L, B, Q, D = hs.shape
    # reference for lvl 0 is init_reference, else inter_references[lvl-1] (B == 1)
    refs = jnp.concatenate([init_reference[None, 0],
                            inter_references[:-1, 0]], axis=0)          # (L, Q, 2)
    # lane-pad references with 0.5 (inverse_sigmoid(0.5) == 0 -> no-op add).
    refp = jnp.full((L * Q, LANES), 0.5, jnp.float32)
    refp = refp.at[:, :2].set(refs.reshape(L * Q, 2))
    hs_flat = hs[:, 0].reshape(L * Q, D)                                # (L*Q, D)

    srcs0, slab = motr_fused(feat_rows, params, head_packed, hs_flat, refp)
    srcs0 = srcs0.reshape(N, HW, D)                                     # channels-last
    slab = slab.reshape(L, Q, LANES)
    outputs_coord = slab[..., 0:4]                                      # (L, Q, 4)
    outputs_class = slab[..., D:D + NUM_CLASSES]                        # (L, Q, C)

    ref_pts_all = jnp.concatenate([init_reference[None],
                                   inter_references[:, :, :, :2]], axis=0)

    out = {
        "pred_logits": outputs_class[-1][None],        # (1, Q, C)
        "pred_boxes": outputs_coord[-1][None],         # (1, Q, 4)
        "ref_pts": ref_pts_all[5],                     # (B, Q, 2)
        # full stacked aux arrays (instead of 2*(L-1) tiny sliced XLA ops);
        # index host-side if a per-layer list of dicts is needed.
        "aux_outputs": {"pred_logits": outputs_class[:-1],
                        "pred_boxes": outputs_coord[:-1]},
        # eval-mode track scores: sigmoid of class-0 logit of last layer, batch 0
        "track_scores": jax.nn.sigmoid(outputs_class[-1, :, 0]),
        "output_embedding": hs[-1, 0],                 # (Q, D)
        "srcs0": srcs0,                                # (N, H*W, D) channels-last
    }
    return out


# ---------------------------------------------------------------------------
# Pure-jnp reference (same math, no Pallas) for a correctness check
# ---------------------------------------------------------------------------
def _reference(params, feat_nhwc, hs, init_reference, inter_references):
    N, Hh, Ww, Cin = feat_nhwc.shape
    x = feat_nhwc.reshape(N, Hh * Ww, Cin)
    y = x @ params["proj_w"] + params["proj_b"]                         # (N, HW, D)
    g = HIDDEN // GN_GROUPS
    yg = y.reshape(N, Hh * Ww, GN_GROUPS, g)
    mean = yg.mean(axis=(1, 3), keepdims=True)
    var = ((yg - mean) ** 2).mean(axis=(1, 3), keepdims=True)
    yn = (yg - mean) / jnp.sqrt(var + GN_EPS)
    srcs0 = yn.reshape(N, Hh * Ww, HIDDEN) * params["gn_gamma"] + params["gn_beta"]

    refs = jnp.concatenate([init_reference[None, 0], inter_references[:-1, 0]], axis=0)
    h = hs[:, 0]
    logits = h @ params["cls_w"] + params["cls_b"]
    x = jax.nn.relu(h @ params["mlp_w1"] + params["mlp_b1"])
    x = jax.nn.relu(x @ params["mlp_w2"] + params["mlp_b2"])
    t = x @ params["mlp_w3"] + params["mlp_b3"]
    r = jnp.clip(refs, 0.0, 1.0)
    inv = jnp.log(jnp.maximum(r, INV_SIG_EPS) / jnp.maximum(1.0 - r, INV_SIG_EPS))
    t = t.at[..., :2].add(inv)
    coords = jax.nn.sigmoid(t)
    return srcs0, logits, coords


if __name__ == "__main__":
    key = jax.random.PRNGKey(0)
    k_param, k_feat, k_hs, k_ref0, k_refi = jax.random.split(key, 5)

    params = init_params(k_param)
    head_packed = pack_head_params(params)   # one-time weight fusion / lane padding

    # Stand-ins for the backbone feature map (channels-last, TPU-native layout)
    # and the deformable-transformer outputs (deterministic).
    # TODO(synk): real backbone / transformer / tracker are external modules.
    feat = jax.random.normal(k_feat, (BATCH, H, W, CIN), jnp.float32)
    hs = jnp.tanh(jax.random.normal(
        k_hs, (NUM_DEC_LAYERS, BATCH, NUM_QUERIES, HIDDEN), jnp.float32))
    init_reference = jax.nn.sigmoid(jax.random.normal(
        k_ref0, (BATCH, NUM_QUERIES, 2), jnp.float32))
    inter_references = jax.nn.sigmoid(jax.random.normal(
        k_refi, (NUM_DEC_LAYERS, BATCH, NUM_QUERIES, 2), jnp.float32))

    out = motr_head_forward(params, head_packed, feat, hs,
                            init_reference, inter_references)
    jax.block_until_ready(out["pred_boxes"])

    # correctness check vs. pure-jnp reference
    ref_srcs0, ref_logits, ref_coords = _reference(
        params, feat, hs, init_reference, inter_references)
    assert jnp.allclose(out["srcs0"], ref_srcs0, atol=1e-4, rtol=1e-4)
    assert jnp.allclose(out["pred_logits"][0], ref_logits[-1], atol=1e-4, rtol=1e-4)
    assert jnp.allclose(out["pred_boxes"][0], ref_coords[-1], atol=1e-4, rtol=1e-4)
    assert jnp.allclose(out["aux_outputs"]["pred_logits"], ref_logits[:-1],
                        atol=1e-4, rtol=1e-4)
    assert jnp.allclose(out["aux_outputs"]["pred_boxes"], ref_coords[:-1],
                        atol=1e-4, rtol=1e-4)
    assert jnp.allclose(out["track_scores"],
                        jax.nn.sigmoid(ref_logits[-1, :, 0]), atol=1e-5)

    print("KERNEL_OK")
</pallas_src>

<mosaic_0001>
module attributes {stable_mosaic.version = 11 : i64} {
  func.func @_motr_fused_kernel(%arg0: i32, %arg1: memref<256x4xf32, #tpu.memory_space<vmem>>, %arg2: memref<4x32xf32, #tpu.memory_space<vmem>>, %arg3: memref<1x32xf32, #tpu.memory_space<vmem>>, %arg4: memref<1x32xf32, #tpu.memory_space<vmem>>, %arg5: memref<1x32xf32, #tpu.memory_space<vmem>>, %arg6: memref<48x32xf32, #tpu.memory_space<vmem>>, %arg7: memref<48x128xf32, #tpu.memory_space<vmem>>, %arg8: memref<32x128xf32, #tpu.memory_space<vmem>>, %arg9: memref<1x128xf32, #tpu.memory_space<vmem>>, %arg10: memref<32x32xf32, #tpu.memory_space<vmem>>, %arg11: memref<1x32xf32, #tpu.memory_space<vmem>>, %arg12: memref<32x128xf32, #tpu.memory_space<vmem>>, %arg13: memref<1x128xf32, #tpu.memory_space<vmem>>, %arg14: memref<256x32xf32, #tpu.memory_space<vmem>>, %arg15: memref<48x128xf32, #tpu.memory_space<vmem>>) attributes {dimension_semantics = [#tpu.dimension_semantics<arbitrary>], iteration_bounds = array<i64: 1>, scalar_prefetch = 0 : i64, scratch_operands = 0 : i64, tpu.core_type = #tpu.core_type<tc>, window_params = [{pipeline_mode = #tpu.pipeline_mode<synchronous>, transform_indices = @transform_0, window_bounds = array<i64: 256, 4>}, {pipeline_mode = #tpu.pipeline_mode<synchronous>, transform_indices = @transform_1, window_bounds = array<i64: 4, 32>}, {pipeline_mode = #tpu.pipeline_mode<synchronous>, transform_indices = @transform_2, window_bounds = array<i64: 1, 32>}, {pipeline_mode = #tpu.pipeline_mode<synchronous>, transform_indices = @transform_3, window_bounds = array<i64: 1, 32>}, {pipeline_mode = #tpu.pipeline_mode<synchronous>, transform_indices = @transform_4, window_bounds = array<i64: 1, 32>}, {pipeline_mode = #tpu.pipeline_mode<synchronous>, transform_indices = @transform_5, window_bounds = array<i64: 48, 32>}, {pipeline_mode = #tpu.pipeline_mode<synchronous>, transform_indices = @transform_6, window_bounds = array<i64: 48, 128>}, {pipeline_mode = #tpu.pipeline_mode<synchronous>, transform_indices = @transform_7, window_bounds = array<i64: 32, 128>}, {pipeline_mode = #tpu.pipeline_mode<synchronous>, transform_indices = @transform_8, window_bounds = array<i64: 1, 128>}, {pipeline_mode = #tpu.pipeline_mode<synchronous>, transform_indices = @transform_9, window_bounds = array<i64: 32, 32>}, {pipeline_mode = #tpu.pipeline_mode<synchronous>, transform_indices = @transform_10, window_bounds = array<i64: 1, 32>}, {pipeline_mode = #tpu.pipeline_mode<synchronous>, transform_indices = @transform_11, window_bounds = array<i64: 32, 128>}, {pipeline_mode = #tpu.pipeline_mode<synchronous>, transform_indices = @transform_12, window_bounds = array<i64: 1, 128>}, {pipeline_mode = #tpu.pipeline_mode<synchronous>, transform_indices = @transform_13, window_bounds = array<i64: 256, 32>}, {pipeline_mode = #tpu.pipeline_mode<synchronous>, transform_indices = @transform_14, window_bounds = array<i64: 48, 128>}]} {
    %c0 = arith.constant 0 : index
    %c0_0 = arith.constant 0 : index
    %0 = vector.load %arg1[%c0, %c0_0] : memref<256x4xf32, #tpu.memory_space<vmem>>, vector<256x4xf32>
    %c0_1 = arith.constant 0 : index
    %c0_2 = arith.constant 0 : index
    %1 = vector.load %arg2[%c0_1, %c0_2] : memref<4x32xf32, #tpu.memory_space<vmem>>, vector<4x32xf32>
    %cst = arith.constant dense<0.000000e+00> : vector<256x32xf32>
    %2 = tpu.matmul %0, %1, %cst {dimension_numbers = #tpu.dot_dimension_numbers<[1], [0], [0], [1], [0, 0, 1, 1], [], []>} : vector<256x4xf32>, vector<4x32xf32>, vector<256x32xf32> -> vector<256x32xf32>
    %c0_3 = arith.constant 0 : index
    %c0_4 = arith.constant 0 : index
    %3 = vector.load %arg3[%c0_3, %c0_4] : memref<1x32xf32, #tpu.memory_space<vmem>>, vector<1x32xf32>
    %4 = vector.broadcast %3 : vector<1x32xf32> to vector<256x32xf32>
    %5 = arith.addf %2, %4 : vector<256x32xf32>
    %cst_5 = arith.constant dense<0.000000e+00> : vector<32xf32>
    %6 = vector.multi_reduction <add>, %5, %cst_5 [0] : vector<256x32xf32> to vector<32xf32>
    %7 = vector.shape_cast %6 : vector<32xf32> to vector<1x32xf32>
    %cst_6 = arith.constant 2.560000e+02 : f32
    %8 = vector.broadcast %cst_6 : f32 to vector<1x32xf32>
    %9 = arith.divf %7, %8 : vector<1x32xf32>
    %10 = arith.mulf %5, %5 : vector<256x32xf32>
    %cst_7 = arith.constant dense<0.000000e+00> : vector<32xf32>
    %11 = vector.multi_reduction <add>, %10, %cst_7 [0] : vector<256x32xf32> to vector<32xf32>
    %12 = vector.shape_cast %11 : vector<32xf32> to vector<1x32xf32>
    %cst_8 = arith.constant 2.560000e+02 : f32
    %13 = vector.broadcast %cst_8 : f32 to vector<1x32xf32>
    %14 = arith.divf %12, %13 : vector<1x32xf32>
    %15 = arith.mulf %9, %9 : vector<1x32xf32>
    %16 = arith.subf %14, %15 : vector<1x32xf32>
    %cst_9 = arith.constant 0.000000e+00 : f32
    %17 = vector.broadcast %cst_9 : f32 to vector<1x32xf32>
    %18 = arith.maximumf %16, %17 : vector<1x32xf32>
    %cst_10 = arith.constant 9.99999974E-6 : f32
    %19 = vector.broadcast %cst_10 : f32 to vector<1x32xf32>
    %20 = arith.addf %18, %19 : vector<1x32xf32>
    %21 = math.rsqrt %20 : vector<1x32xf32>
    %22 = vector.broadcast %9 : vector<1x32xf32> to vector<256x32xf32>
    %23 = arith.subf %5, %22 : vector<256x32xf32>
    %24 = vector.broadcast %21 : vector<1x32xf32> to vector<256x32xf32>
    %25 = arith.mulf %23, %24 : vector<256x32xf32>
    %c0_11 = arith.constant 0 : index
    %c0_12 = arith.constant 0 : index
    %26 = vector.load %arg4[%c0_11, %c0_12] : memref<1x32xf32, #tpu.memory_space<vmem>>, vector<1x32xf32>
    %27 = vector.broadcast %26 : vector<1x32xf32> to vector<256x32xf32>
    %28 = arith.mulf %25, %27 : vector<256x32xf32>
    %c0_13 = arith.constant 0 : index
    %c0_14 = arith.constant 0 : index
    %29 = vector.load %arg5[%c0_13, %c0_14] : memref<1x32xf32, #tpu.memory_space<vmem>>, vector<1x32xf32>
    %30 = vector.broadcast %29 : vector<1x32xf32> to vector<256x32xf32>
    %31 = arith.addf %28, %30 : vector<256x32xf32>
    %c0_15 = arith.constant 0 : index
    %c0_16 = arith.constant 0 : index
    %32 = vector.load %arg14[%c0_15, %c0_16] : memref<256x32xf32, #tpu.memory_space<vmem>>, vector<256x32xf32>
    tpu.vector_store %arg14[%c0_15, %c0_16], %31 {strides = array<i32>} : memref<256x32xf32, #tpu.memory_space<vmem>>, vector<256x32xf32>,
    %c0_17 = arith.constant 0 : index
    %c0_18 = arith.constant 0 : index
    %33 = vector.load %arg6[%c0_17, %c0_18] : memref<48x32xf32, #tpu.memory_space<vmem>>, vector<48x32xf32>
    %c0_19 = arith.constant 0 : index
    %c0_20 = arith.constant 0 : index
    %34 = vector.load %arg8[%c0_19, %c0_20] : memref<32x128xf32, #tpu.memory_space<vmem>>, vector<32x128xf32>
    %cst_21 = arith.constant dense<0.000000e+00> : vector<48x128xf32>
    %35 = tpu.matmul %33, %34, %cst_21 {dimension_numbers = #tpu.dot_dimension_numbers<[1], [0], [0], [1], [0, 0, 1, 1], [], []>} : vector<48x32xf32>, vector<32x128xf32>, vector<48x128xf32> -> vector<48x128xf32>
    %c0_22 = arith.constant 0 : index
    %c0_23 = arith.constant 0 : index
    %36 = vector.load %arg9[%c0_22, %c0_23] : memref<1x128xf32, #tpu.memory_space<vmem>>, vector<1x128xf32>
    %37 = vector.broadcast %36 : vector<1x128xf32> to vector<48x128xf32>
    %38 = arith.addf %35, %37 : vector<48x128xf32>
    %39 = vector.extract_strided_slice %38 {offsets = [0, 0], sizes = [48, 32], strides = [1, 1]} : vector<48x128xf32> to vector<48x32xf32>
    %cst_24 = arith.constant 0.000000e+00 : f32
    %40 = vector.broadcast %cst_24 : f32 to vector<48x32xf32>
    %41 = arith.maximumf %39, %40 : vector<48x32xf32>
    %c0_25 = arith.constant 0 : index
    %c0_26 = arith.constant 0 : index
    %42 = vector.load %arg10[%c0_25, %c0_26] : memref<32x32xf32, #tpu.memory_space<vmem>>, vector<32x32xf32>
    %cst_27 = arith.constant dense<0.000000e+00> : vector<48x32xf32>
    %43 = tpu.matmul %41, %42, %cst_27 {dimension_numbers = #tpu.dot_dimension_numbers<[1], [0], [0], [1], [0, 0, 1, 1], [], []>} : vector<48x32xf32>, vector<32x32xf32>, vector<48x32xf32> -> vector<48x32xf32>
    %c0_28 = arith.constant 0 : index
    %c0_29 = arith.constant 0 : index
    %44 = vector.load %arg11[%c0_28, %c0_29] : memref<1x32xf32, #tpu.memory_space<vmem>>, vector<1x32xf32>
    %45 = vector.broadcast %44 : vector<1x32xf32> to vector<48x32xf32>
    %46 = arith.addf %43, %45 : vector<48x32xf32>
    %cst_30 = arith.constant 0.000000e+00 : f32
    %47 = vector.broadcast %cst_30 : f32 to vector<48x32xf32>
    %48 = arith.maximumf %46, %47 : vector<48x32xf32>
    %c0_31 = arith.constant 0 : index
    %c0_32 = arith.constant 0 : index
    %49 = vector.load %arg12[%c0_31, %c0_32] : memref<32x128xf32, #tpu.memory_space<vmem>>, vector<32x128xf32>
    %cst_33 = arith.constant dense<0.000000e+00> : vector<48x128xf32>
    %50 = tpu.matmul %48, %49, %cst_33 {dimension_numbers = #tpu.dot_dimension_numbers<[1], [0], [0], [1], [0, 0, 1, 1], [], []>} : vector<48x32xf32>, vector<32x128xf32>, vector<48x128xf32> -> vector<48x128xf32>
    %c0_34 = arith.constant 0 : index
    %c0_35 = arith.constant 0 : index
    %51 = vector.load %arg13[%c0_34, %c0_35] : memref<1x128xf32, #tpu.memory_space<vmem>>, vector<1x128xf32>
    %52 = vector.broadcast %51 : vector<1x128xf32> to vector<48x128xf32>
    %53 = arith.addf %50, %52 : vector<48x128xf32>
    %c0_36 = arith.constant 0 : index
    %c0_37 = arith.constant 0 : index
    %54 = vector.load %arg7[%c0_36, %c0_37] : memref<48x128xf32, #tpu.memory_space<vmem>>, vector<48x128xf32>
    %cst_38 = arith.constant 0.000000e+00 : f32
    %cst_39 = arith.constant 1.000000e+00 : f32
    %55 = vector.broadcast %cst_38 : f32 to vector<48x128xf32>
    %56 = arith.maximumf %55, %54 : vector<48x128xf32>
    %57 = vector.broadcast %cst_39 : f32 to vector<48x128xf32>
    %58 = arith.minimumf %57, %56 : vector<48x128xf32>
    %cst_40 = arith.constant 9.99999974E-6 : f32
    %59 = vector.broadcast %cst_40 : f32 to vector<48x128xf32>
    %60 = arith.maximumf %58, %59 : vector<48x128xf32>
    %cst_41 = arith.constant 1.000000e+00 : f32
    %61 = vector.broadcast %cst_41 : f32 to vector<48x128xf32>
    %62 = arith.subf %61, %58 : vector<48x128xf32>
    %cst_42 = arith.constant 9.99999974E-6 : f32
    %63 = vector.broadcast %cst_42 : f32 to vector<48x128xf32>
    %64 = arith.maximumf %62, %63 : vector<48x128xf32>
    %65 = arith.divf %60, %64 : vector<48x128xf32>
    %66 = math.log %65 : vector<48x128xf32>
    %67 = arith.addf %53, %66 : vector<48x128xf32>
    %68 = arith.negf %67 : vector<48x128xf32>
    %69 = math.exp %68 : vector<48x128xf32>
    %cst_43 = arith.constant 1.000000e+00 : f32
    %70 = vector.broadcast %cst_43 : f32 to vector<48x128xf32>
    %71 = arith.addf %70, %69 : vector<48x128xf32>
    %72 = arith.divf %70, %71 : vector<48x128xf32>
    %73 = tpu.iota {dimensions = array<i32: 1>} : vector<48x128xi32>
    %c4_i32 = arith.constant 4 : i32
    %74 = vector.broadcast %c4_i32 : i32 to vector<48x128xi32>
    %75 = arith.cmpi slt, %73, %74 : vector<48x128xi32>
    %c32_i32 = arith.constant 32 : i32
    %76 = vector.broadcast %c32_i32 : i32 to vector<48x128xi32>
    %77 = arith.cmpi slt, %73, %76 : vector<48x128xi32>
    %cst_44 = arith.constant 0.000000e+00 : f32
    %78 = vector.broadcast %cst_44 : f32 to vector<48x128xf32>
    %79 = arith.select %77, %78, %38 : vector<48x128xi1>, vector<48x128xf32>
    %80 = arith.select %75, %72, %79 : vector<48x128xi1>, vector<48x128xf32>
    %c0_45 = arith.constant 0 : index
    %c0_46 = arith.constant 0 : index
    %81 = vector.load %arg15[%c0_45, %c0_46] : memref<48x128xf32, #tpu.memory_space<vmem>>, vector<48x128xf32>
    tpu.vector_store %arg15[%c0_45, %c0_46], %80 {strides = array<i32>} : memref<48x128xf32, #tpu.memory_space<vmem>>, vector<48x128xf32>,
    return
  }
  func.func @transform_0(%arg0: i32) -> (i32, i32) {
    %c0_i32 = arith.constant 0 : i32
    %c0_i32_0 = arith.constant 0 : i32
    %c0_i32_1 = arith.constant 0 : i32
    return %c0_i32, %c0_i32_0 : i32, i32
  }
  func.func @transform_1(%arg0: i32) -> (i32, i32) {
    %c0_i32 = arith.constant 0 : i32
    %c0_i32_0 = arith.constant 0 : i32
    %c0_i32_1 = arith.constant 0 : i32
    return %c0_i32, %c0_i32_0 : i32, i32
  }
  func.func @transform_2(%arg0: i32) -> (i32, i32) {
    %c0_i32 = arith.constant 0 : i32
    %c0_i32_0 = arith.constant 0 : i32
    %c0_i32_1 = arith.constant 0 : i32
    return %c0_i32, %c0_i32_0 : i32, i32
  }
  func.func @transform_3(%arg0: i32) -> (i32, i32) {
    %c0_i32 = arith.constant 0 : i32
    %c0_i32_0 = arith.constant 0 : i32
    %c0_i32_1 = arith.constant 0 : i32
    return %c0_i32, %c0_i32_0 : i32, i32
  }
  func.func @transform_4(%arg0: i32) -> (i32, i32) {
    %c0_i32 = arith.constant 0 : i32
    %c0_i32_0 = arith.constant 0 : i32
    %c0_i32_1 = arith.constant 0 : i32
    return %c0_i32, %c0_i32_0 : i32, i32
  }
  func.func @transform_5(%arg0: i32) -> (i32, i32) {
    %c0_i32 = arith.constant 0 : i32
    %c0_i32_0 = arith.constant 0 : i32
    %c0_i32_1 = arith.constant 0 : i32
    return %c0_i32, %c0_i32_0 : i32, i32
  }
  func.func @transform_6(%arg0: i32) -> (i32, i32) {
    %c0_i32 = arith.constant 0 : i32
    %c0_i32_0 = arith.constant 0 : i32
    %c0_i32_1 = arith.constant 0 : i32
    return %c0_i32, %c0_i32_0 : i32, i32
  }
  func.func @transform_7(%arg0: i32) -> (i32, i32) {
    %c0_i32 = arith.constant 0 : i32
    %c0_i32_0 = arith.constant 0 : i32
    %c0_i32_1 = arith.constant 0 : i32
    return %c0_i32, %c0_i32_0 : i32, i32
  }
  func.func @transform_8(%arg0: i32) -> (i32, i32) {
    %c0_i32 = arith.constant 0 : i32
    %c0_i32_0 = arith.constant 0 : i32
    %c0_i32_1 = arith.constant 0 : i32
    return %c0_i32, %c0_i32_0 : i32, i32
  }
  func.func @transform_9(%arg0: i32) -> (i32, i32) {
    %c0_i32 = arith.constant 0 : i32
    %c0_i32_0 = arith.constant 0 : i32
    %c0_i32_1 = arith.constant 0 : i32
    return %c0_i32, %c0_i32_0 : i32, i32
  }
  func.func @transform_10(%arg0: i32) -> (i32, i32) {
    %c0_i32 = arith.constant 0 : i32
    %c0_i32_0 = arith.constant 0 : i32
    %c0_i32_1 = arith.constant 0 : i32
    return %c0_i32, %c0_i32_0 : i32, i32
  }
  func.func @transform_11(%arg0: i32) -> (i32, i32) {
    %c0_i32 = arith.constant 0 : i32
    %c0_i32_0 = arith.constant 0 : i32
    %c0_i32_1 = arith.constant 0 : i32
    return %c0_i32, %c0_i32_0 : i32, i32
  }
  func.func @transform_12(%arg0: i32) -> (i32, i32) {
    %c0_i32 = arith.constant 0 : i32
    %c0_i32_0 = arith.constant 0 : i32
    %c0_i32_1 = arith.constant 0 : i32
    return %c0_i32, %c0_i32_0 : i32, i32
  }
  func.func @transform_13(%arg0: i32) -> (i32, i32) {
    %c0_i32 = arith.constant 0 : i32
    %c0_i32_0 = arith.constant 0 : i32
    %c0_i32_1 = arith.constant 0 : i32
    return %c0_i32, %c0_i32_0 : i32, i32
  }
  func.func @transform_14(%arg0: i32) -> (i32, i32) {
    %c0_i32 = arith.constant 0 : i32
    %c0_i32_0 = arith.constant 0 : i32
    %c0_i32_1 = arith.constant 0 : i32
    return %c0_i32, %c0_i32_0 : i32, i32
  }
}

</mosaic_0001>

<bundles_post_ra>
// kernel: tpu_custom_call.1
= control target key start
LH: loop header
LB: loop body
LE: loop exit
PB: predicated region body
PF: predicated region fallthrough
CT: control target
= control target key end

     0   :  { %vm184_vm0 = vcmask 1043456   ;;  %vm87_vm1 = vcmask 31744   ;;  %vm413_vm2 = vcmask 261120   ;;  %s2444_s0 = inlined_call_operand.vmem [shape: f32[256,4], index: 0, kind: input, shape index: {}]   ;;  %s2445_s1 = inlined_call_operand.vmem [shape: f32[4,32], index: 1, kind: input, shape index: {}]   ;;  %s2446_s2 = inlined_call_operand.vmem [shape: f32[1,32], index: 2, kind: input, shape index: {}]   ;;  %s2447_s3 = inlined_call_operand.vmem [shape: f32[1,32], index: 3, kind: input, shape index: {}]   ;;  %s2448_s4 = inlined_call_operand.vmem [shape: f32[1,32], index: 4, kind: input, shape index: {}]   ;;  %s2449_s5 = inlined_call_operand.vmem [shape: f32[48,32], index: 5, kind: input, shape index: {}]   ;;  %s2450_s6 = inlined_call_operand.vmem [shape: f32[48,128], index: 6, kind: input, shape index: {}]   ;;  %s2451_s7 = inlined_call_operand.vmem [shape: f32[32,128], index: 7, kind: input, shape index: {}]   ;;  %s2452_s8 = inlined_call_operand.vmem [shape: f32[1,128], index: 8, kind: input, shape index: {}]   ;;  %s2453_s9 = inlined_call_operand.vmem [shape: f32[32,32], index: 9, kind: input, shape index: {}]   ;;  %s2454_s10 = inlined_call_operand.vmem [shape: f32[1,32], index: 10, kind: input, shape index: {}]   ;;  %s2455_s11 = inlined_call_operand.vmem [shape: f32[32,128], index: 11, kind: input, shape index: {}]   ;;  %s2456_s12 = inlined_call_operand.vmem [shape: f32[1,128], index: 12, kind: input, shape index: {}]   ;;  %s2457_s13 = inlined_call_operand.vmem [shape: f32[256,32], index: 13, kind: output, shape index: {0}]   ;;  %s2458_s14 = inlined_call_operand.hbm [shape: f32[48,128], index: 14, kind: output, shape index: {1}]  }
   0x1   :  { %v79_v0 = vld [vmem:[%s2445_s1] sm:$0xf]  ;;  %v73_v2 = vld [vmem:[%s2444_s0 + $0xd0] sm:$0xff]  ;;  %v48_v3 = vld [vmem:[%s2444_s0 + $0x8] sm:$0xff] }
   0x2   :  { %v47_v1 = vld [vmem:[%s2444_s0] sm:$0xff]  ;;  %1426 = vmatprep.subr.msk.mxu0 %vm184_vm0, %v79_v0  ;;  %1527 = vmatprep.subr.msk.mxu1 %vm184_vm0, %v79_v0  ;;  %v74_v4 = vld [vmem:[%s2444_s0 + $0xd8] sm:$0xff]  ;;  %v49_v6 = vld [vmem:[%s2444_s0 + $0x10] sm:$0xff] }
   0x3   :  { %1427 = vmatpush3.msk.msra.mxu0 %vm184_vm0, %v79_v0  ;;  %1528 = vmatpush3.msk.msra.mxu1 %vm184_vm0, %v79_v0  ;;  %v775_v5 = vld [vmem:[%s2451_s7 + $0x18] sm:$0xff]  ;;  %v75_v7 = vld [vmem:[%s2444_s0 + $0xe0] sm:$0xff]  ;;  %v774_v8 = vld [vmem:[%s2451_s7 + $0x10] sm:$0xff] }
   0x4   :  { %1428 = vmatprep.mubr.msk.f32.mxu0 %vm87_vm1, %v47_v1  ;;  %1467 = vmatprep.mubr.msk.f32.mxu1 %vm87_vm1, %v73_v2  ;;  %v50_v9 = vld [vmem:[%s2444_s0 + $0x18] sm:$0xff]  ;;  %v76_v10 = vld [vmem:[%s2444_s0 + $0xe8] sm:$0xff]  ;;  %v51_v11 = vld [vmem:[%s2444_s0 + $0x20] sm:$0xff] }
   0x5   :  { %1429 = vmatmul.mubr.msk.f32.vlgmr.msra.gmra.mxu0 %vm87_vm1, %v48_v3  ;;  %1468 = vmatmul.mubr.msk.f32.vlgmr.msra.gmra.mxu1 %vm87_vm1, %v74_v4  ;;  %v773_v12 = vld [vmem:[%s2451_s7 + $0x8] sm:$0xff]  ;;  %v77_v13 = vld [vmem:[%s2444_s0 + $0xf0] sm:$0xff]  ;;  %v78_v15 = vld [vmem:[%s2444_s0 + $0xf8] sm:$0xff] }
   0x6   :  { %1476 = vmatprep.subr.mxu1 %v775_v5  ;;  %1431 = vmatprep.mubr.msk.f32.mxu0 %vm87_vm1, %v49_v6  ;;  %v52_v14 = vld [vmem:[%s2444_s0 + $0x28] sm:$0xff]  ;;  %v772_v16 = vld [vmem:[%s2451_s7] sm:$0xff]  ;;  %v53_v17 = vld [vmem:[%s2444_s0 + $0x30] sm:$0xff] }
   0x7   :  { %1477 = vmatpush3.msra.mxu1 %v775_v5  ;;  %1470 = vmatprep.mubr.msk.f32.mxu1 %vm87_vm1, %v75_v7  ;;  %v766_v18 = vld [vmem:[%s2449_s5] sm:$0xff]  ;;  %v54_v19 = vld [vmem:[%s2444_s0 + $0x38] sm:$0xff]  ;;  %v767_v20 = vld [vmem:[%s2449_s5 + $0x8] sm:$0xff] }
   0x8   :  { %1478 = vmatprep.subr.mxu1 %v774_v8  ;;  %v55_v21 = vld [vmem:[%s2444_s0 + $0x40] sm:$0xff]  ;;  %v768_v22 = vld [vmem:[%s2449_s5 + $0x10] sm:$0xff] }
   0x9   :  { %1432 = vmatmul.mubr.msk.f32.gmra.mxu0 %vm87_vm1, %v50_v9  ;;  %1471 = vmatmul.mubr.msk.f32.gmra.mxu1 %vm87_vm1, %v76_v10 }
   0xa   :  { %1479 = vmatpush3.msra.mxu1 %v774_v8  ;;  %1434 = vmatprep.mubr.msk.f32.mxu0 %vm87_vm1, %v51_v11 }
   0xb   :  { %1480 = vmatprep.subr.mxu1 %v773_v12  ;;  %1473 = vmatprep.mubr.msk.f32.mxu1 %vm87_vm1, %v77_v13 }
   0xc   :  { %1481 = vmatpush3.msra.mxu1 %v773_v12 }
   0xd   :  { %1435 = vmatmul.mubr.msk.f32.gmra.mxu0 %vm87_vm1, %v52_v14  ;;  %1474 = vmatmul.mubr.msk.f32.gmra.mxu1 %vm87_vm1, %v78_v15 }
   0xe   :  { %1482 = vmatprep.subr.mxu1 %v772_v16  ;;  %1437 = vmatprep.mubr.msk.f32.mxu0 %vm87_vm1, %v53_v17 }
   0xf   :  { %1483 = vmatpush3.msra.mxu1 %v772_v16  ;;  %1484 = vmatprep.mubr.msk.f32.mxu1 %vm413_vm2, %v766_v18 }
  0x10   :  { %20 = vsyncpa [#allocation3], 0  ;;  %v56_v23 = vld [vmem:[%s2444_s0 + $0x48] sm:$0xff]  ;;  %v769_v24 = vld [vmem:[%s2449_s5 + $0x18] sm:$0xff] }
  0x11   :  { %1438 = vmatmul.mubr.msk.f32.gmra.mxu0 %vm87_vm1, %v54_v19  ;;  %1485 = vmatmul.mubr.msk.f32.vlgmr.msra.gmra.mxu1 %vm413_vm2, %v767_v20  ;;  %v57_v25 = vld [vmem:[%s2444_s0 + $0x50] sm:$0xff]  ;;  %v770_v26 = vld [vmem:[%s2449_s5 + $0x20] sm:$0xff]  ;;  %v58_v27 = vld [vmem:[%s2444_s0 + $0x58] sm:$0xff] }
  0x12   :  { %1440 = vmatprep.mubr.msk.f32.mxu0 %vm87_vm1, %v55_v21  ;;  %1487 = vmatprep.mubr.msk.f32.mxu1 %vm413_vm2, %v768_v22  ;;  %v771_v28 = vld [vmem:[%s2449_s5 + $0x28] sm:$0xff]  ;;  %v59_v29 = vld [vmem:[%s2444_s0 + $0x60] sm:$0xff]  ;;  %v61_v31 = vld [vmem:[%s2444_s0 + $0x70] sm:$0xff] }
  0x13   :  { %v60_v30 = vld [vmem:[%s2444_s0 + $0x68] sm:$0xff]  ;;  %v62_v32 = vld [vmem:[%s2444_s0 + $0x78] sm:$0xff]  ;;  %v63_v33 = vld [vmem:[%s2444_s0 + $0x80] sm:$0xff] }
  0x14   :  { %v64_v34 = vld [vmem:[%s2444_s0 + $0x88] sm:$0xff]  ;;  %v65_v35 = vld [vmem:[%s2444_s0 + $0x90] sm:$0xff]  ;;  %v66_v36 = vld [vmem:[%s2444_s0 + $0x98] sm:$0xff] }
  0x15   :  { %1441 = vmatmul.mubr.msk.f32.gmra.mxu0 %vm87_vm1, %v56_v23  ;;  %1488 = vmatmul.mubr.msk.f32.gmra.mxu1 %vm413_vm2, %v769_v24  ;;  %v67_v37 = vld [vmem:[%s2444_s0 + $0xa0] sm:$0xff]  ;;  %v68_v38 = vld [vmem:[%s2444_s0 + $0xa8] sm:$0xff]  ;;  %v69_v39 = vld [vmem:[%s2444_s0 + $0xb0] sm:$0xff] }
  0x16   :  { %1443 = vmatprep.mubr.msk.f32.mxu0 %vm87_vm1, %v57_v25  ;;  %1490 = vmatprep.mubr.msk.f32.mxu1 %vm413_vm2, %v770_v26  ;;  %v70_v40 = vld [vmem:[%s2444_s0 + $0xb8] sm:$0xff]  ;;  %v71_v41 = vld [vmem:[%s2444_s0 + $0xc0] sm:$0xff]  ;;  %v72_v42 = vld [vmem:[%s2444_s0 + $0xc8] sm:$0xff] }
  0x17   :  { %v905_v43 = vld [vmem:[%s2453_s9 + $0x18] sm:$0xff]  ;;  %v904_v44 = vld [vmem:[%s2453_s9 + $0x10] sm:$0xff]  ;;  %v903_v45 = vld [vmem:[%s2453_s9 + $0x8] sm:$0xff] }
  0x18   :  { %1493 = vmatprep.subr.mxu1 %v905_v43  ;;  %v902_v46 = vld [vmem:[%s2453_s9] sm:$0xff]  ;;  %v1895_v0 = vld [vmem:[%s2455_s11 + $0x18] sm:$0xff] }
  0x19   :  { %1444 = vmatmul.mubr.msk.f32.gmra.mxu0 %vm87_vm1, %v58_v27  ;;  %1491 = vmatmul.mubr.msk.f32.gmra.mxu1 %vm413_vm2, %v771_v28  ;;  %v1864_v48 = vld [vmem:[%s2446_s2] ss:$0 sm:$0xff] }
  0x1a   :  { %1446 = vmatprep.mubr.msk.f32.mxu0 %vm87_vm1, %v59_v29  ;;  %1494 = vmatpush3.msra.mxu1 %v905_v43  ;;  %v1930_v24 = vld [vmem:[%s2452_s8] ss:$0 sm:$0xff] }
  0x1b   :  { %1495 = vmatprep.subr.mxu1 %v904_v44 }
  0x1c   :  { %1496 = vmatpush3.msra.mxu1 %v904_v44 }
  0x1d   :  { %1447 = vmatmul.mubr.msk.f32.gmra.mxu0 %vm87_vm1, %v60_v30  ;;  %1497 = vmatprep.subr.mxu1 %v903_v45 }
  0x1e   :  { %1449 = vmatprep.mubr.msk.f32.mxu0 %vm87_vm1, %v61_v31  ;;  %1498 = vmatpush3.msra.mxu1 %v903_v45 }
  0x1f   :  { %1499 = vmatprep.subr.mxu1 %v902_v46 }
  0x20   :  { %1500 = vmatpush3.msra.mxu1 %v902_v46 }
  0x21   :  { %1450 = vmatmul.mubr.msk.f32.gmra.mxu0 %vm87_vm1, %v62_v32  ;;  %1510 = vmatprep.subr.mxu1 %v1895_v0 }
  0x22   :  { %1452 = vmatprep.mubr.msk.f32.mxu0 %vm87_vm1, %v63_v33 }
  0x25   :  { %1453 = vmatmul.mubr.msk.f32.gmra.mxu0 %vm87_vm1, %v64_v34 }
  0x26   :  { %1455 = vmatprep.mubr.msk.f32.mxu0 %vm87_vm1, %v65_v35 }
  0x29   :  { %1456 = vmatmul.mubr.msk.f32.gmra.mxu0 %vm87_vm1, %v66_v36 }
  0x2a   :  { %1458 = vmatprep.mubr.msk.f32.mxu0 %vm87_vm1, %v67_v37 }
  0x2d   :  { %1459 = vmatmul.mubr.msk.f32.gmra.mxu0 %vm87_vm1, %v68_v38 }
  0x2e   :  { %1461 = vmatprep.mubr.msk.f32.mxu0 %vm87_vm1, %v69_v39 }
  0x31   :  { %1462 = vmatmul.mubr.msk.f32.gmra.mxu0 %vm87_vm1, %v70_v40 }
  0x32   :  { %1464 = vmatprep.mubr.msk.f32.mxu0 %vm87_vm1, %v71_v41 }
  0x35   :  { %1465 = vmatmul.mubr.msk.f32.gmra.mxu0 %vm87_vm1, %v72_v42 }
  0xc5   :  { %v1430_v47 = vpop.f32.mrf.mxu0  ;;  %v1866_v49 = vpop.f32.mrf.mxu1 }
  0xc6   :  { %v1869_v50 = vadd.f32 %v1430_v47, %v1864_v48 }
  0xc7   :  { %v254_v51 = vpop.f32.mrf.mxu0  ;;  %v1871_v52 = vpop.f32.mrf.mxu1 }
  0xc8   :  { %v486_v53 = vmul.f32 %v1869_v50, %v1869_v50  ;;  %v415_v54 = vsel %vm413_vm2, %v1869_v50, 0.0  ;;  %v1878_v55 = vadd.f32 %v1864_v48, %v254_v51 }
  0xc9   :  { %v1433_v56 = vpop.f32.mrf.mxu0  ;;  %v1880_v57 = vpop.f32.mrf.mxu1 }
  0xca   :  { %v1883_v58 = vadd.f32 %v1433_v56, %v1864_v48  ;;  %v518_v59 = vsel %vm413_vm2, %v486_v53, 0.0  ;;  %v414_v60 = vsel %vm413_vm2, %v1878_v55, 0.0  ;;  %v485_v61 = vmul.f32 %v1878_v55, %v1878_v55 }
  0xcb   :  { %v264_v62 = vpop.f32.mrf.mxu0  ;;  %v1890_v63 = vpop.f32.mrf.mxu1  ;;  %v416_v1 = vadd.f32 %v415_v54, %v414_v60 }
  0xcc   :  { %v517_v2 = vsel %vm413_vm2, %v485_v61, 0.0  ;;  %v488_v3 = vmul.f32 %v1883_v58, %v1883_v58  ;;  %v1902_v4 = vadd.f32 %v1864_v48, %v264_v62  ;;  %v419_v9 = vsel %vm413_vm2, %v1883_v58, 0.0 }
  0xcd   :  { %v1436_v5 = vpop.f32.mrf.mxu0  ;;  %v1904_v6 = vpop.f32.mrf.mxu1  ;;  %v519_v7 = vadd.f32 %v518_v59, %v517_v2 }
  0xce   :  { %v1907_v8 = vadd.f32 %v1436_v5, %v1864_v48  ;;  %v417_v10 = vsel %vm413_vm2, %v1902_v4, 0.0  ;;  %v487_v11 = vmul.f32 %v1902_v4, %v1902_v4  ;;  %v522_v15 = vsel %vm413_vm2, %v488_v3, 0.0 }
  0xcf   :  { %v274_v12 = vpop.f32.mrf.mxu0  ;;  %v1915_v13 = vpop.f32.mrf.mxu1  ;;  %v418_v14 = vadd.f32 %v417_v10, %v416_v1 }
  0xd0   :  { %v520_v16 = vsel %vm413_vm2, %v487_v11, 0.0  ;;  %v490_v20 = vmul.f32 %v1907_v8, %v1907_v8  ;;  %v1922_v21 = vadd.f32 %v1864_v48, %v274_v12  ;;  %v423_v27 = vsel %vm413_vm2, %v1907_v8, 0.0  ;;  %v1034_v12 = vld [vmem:[%s2455_s11 + $0x10] sm:$0xff] }
  0xd1   :  { %v1439_v17 = vpop.f32.mrf.mxu0  ;;  %v1486_v18 = vpop.f32.mrf.mxu1  ;;  %v521_v19 = vadd.f32 %v520_v16, %v519_v7  ;;  %v420_v22 = vadd.f32 %v419_v9, %v418_v14 }
  0xd2   :  { %v1925_v23 = vadd.f32 %v1439_v17, %v1864_v48  ;;  %v421_v28 = vsel %vm413_vm2, %v1922_v21, 0.0  ;;  %v489_v29 = vmul.f32 %v1922_v21, %v1922_v21  ;;  %v526_v34 = vsel %vm413_vm2, %v490_v20, 0.0 }
  0xd3   :  { %v284_v25 = vpop.f32.mrf.mxu0  ;;  %v867_v26 = vpop.f32.mrf.mxu1  ;;  %v523_v30 = vadd.f32 %v522_v15, %v521_v19  ;;  %v422_v31 = vadd.f32 %v421_v28, %v420_v22  ;;  %v1941_v36 = vadd.f32 %v1486_v18, %v1930_v24 }
  0xd4   :  { %v524_v35 = vsel %vm413_vm2, %v489_v29, 0.0  ;;  %v492_v38 = vmul.f32 %v1925_v23, %v1925_v23  ;;  %v1946_v39 = vadd.f32 %v1864_v48, %v284_v25  ;;  %v427_v43 = vsel %vm413_vm2, %v1925_v23, 0.0 }
  0xd5   :  { %v1442_v32 = vpop.f32.mrf.mxu0  ;;  %v1489_v33 = vpop.f32.mrf.mxu1  ;;  %v525_v37 = vadd.f32 %v524_v35, %v523_v30  ;;  %v424_v40 = vadd.f32 %v423_v27, %v422_v31  ;;  %v1951_v44 = vadd.f32 %v1930_v24, %v867_v26  ;;  %v897_v56 = vmax.f32 %v1941_v36, 0.0 }
  0xd6   :  { %v1954_v45 = vadd.f32 %v1442_v32, %v1864_v48  ;;  %v425_v46 = vsel %vm413_vm2, %v1946_v39, 0.0  ;;  %v491_v47 = vmul.f32 %v1946_v39, %v1946_v39  ;;  %v530_v62 = vsel %vm413_vm2, %v492_v38, 0.0 }
  0xd7   :  { %v294_v41 = vpop.f32.mrf.mxu0  ;;  %v877_v42 = vpop.f32.mrf.mxu1  ;;  %v527_v51 = vadd.f32 %v526_v34, %v525_v37  ;;  %v426_v59 = vadd.f32 %v425_v46, %v424_v40  ;;  %v896_v60 = vmax.f32 %v1951_v44, 0.0  ;;  %v1970_v3 = vadd.f32 %v1489_v33, %v1930_v24 }
  0xd8   :  { %v1961_v53 = vadd.f32 %v1864_v48, %v294_v41  ;;  %v528_v1 = vsel %vm413_vm2, %v491_v47, 0.0  ;;  %v494_v2 = vmul.f32 %v1954_v45, %v1954_v45  ;;  %v431_v14 = vsel %vm413_vm2, %v1954_v45, 0.0 }
  0xd9   :  { %v1445_v54 = vpop.f32.mrf.mxu0  ;;  %v1492_v61 = vpop.f32.mrf.mxu1  ;;  %v529_v7 = vadd.f32 %v528_v1, %v527_v51  ;;  %v428_v9 = vadd.f32 %v427_v43, %v426_v59  ;;  %1501 = vmatprep.mubr.msk.f32.mxu1 %vm413_vm2, %v896_v60  ;;  %v1983_v15 = vadd.f32 %v1930_v24, %v877_v42  ;;  %v899_v30 = vmax.f32 %v1970_v3, 0.0 }
  0xda   :  { %v429_v10 = vsel %vm413_vm2, %v1961_v53, 0.0  ;;  %v493_v11 = vmul.f32 %v1961_v53, %v1961_v53  ;;  %v1986_v16 = vadd.f32 %v1445_v54, %v1864_v48  ;;  %1502 = vmatmul.mubr.msk.f32.vlgmr.msra.gmra.mxu1 %vm413_vm2, %v897_v56  ;;  %v534_v26 = vsel %vm413_vm2, %v494_v2, 0.0 }
  0xdb   :  { %v304_v5 = vpop.f32.mrf.mxu0  ;;  %v430_v18 = vadd.f32 %v429_v10, %v428_v9  ;;  %v531_v19 = vadd.f32 %v530_v62, %v529_v7  ;;  %v887_v25 = vpop.f32.mrf.mxu1  ;;  %1511 = vmatpush3.msra.mxu1 %v1895_v0  ;;  %v898_v27 = vmax.f32 %v1983_v15, 0.0  ;;  %v2000_v32 = vadd.f32 %v1492_v61, %v1930_v24 }
  0xdc   :  { %v532_v20 = vsel %vm413_vm2, %v493_v11, 0.0  ;;  %v1991_v22 = vadd.f32 %v1864_v48, %v304_v5  ;;  %v496_v28 = vmul.f32 %v1986_v16, %v1986_v16  ;;  %1512 = vmatprep.subr.mxu1 %v1034_v12  ;;  %v435_v0 = vsel %vm413_vm2, %v1986_v16, 0.0 }
  0xdd   :  { %v1448_v17 = vpop.f32.mrf.mxu0  ;;  %v533_v31 = vadd.f32 %v532_v20, %v531_v19  ;;  %v432_v33 = vadd.f32 %v431_v14, %v430_v18  ;;  %1513 = vmatpush3.msra.mxu1 %v1034_v12  ;;  %v2009_v37 = vadd.f32 %v1930_v24, %v887_v25  ;;  %1504 = vmatprep.mubr.msk.f32.mxu1 %vm413_vm2, %v898_v27  ;;  %v901_v56 = vmax.f32 %v2000_v32, 0.0 }
  0xde   :  { %v433_v34 = vsel %vm413_vm2, %v1991_v22, 0.0  ;;  %v495_v35 = vmul.f32 %v1991_v22, %v1991_v22  ;;  %v2013_v42 = vadd.f32 %v1448_v17, %v1864_v48  ;;  %1505 = vmatmul.mubr.msk.f32.gmra.mxu1 %vm413_vm2, %v899_v30  ;;  %v538_v46 = vsel %vm413_vm2, %v496_v28, 0.0 }
  0xdf   :  { %v314_v29 = vpop.f32.mrf.mxu0  ;;  %v434_v40 = vadd.f32 %v433_v34, %v432_v33  ;;  %v535_v41 = vadd.f32 %v534_v26, %v533_v31  ;;  %v900_v24 = vmax.f32 %v2009_v37, 0.0 }
  0xe0   :  { %v2017_v43 = vadd.f32 %v1864_v48, %v314_v29  ;;  %v536_v47 = vsel %vm413_vm2, %v495_v35, 0.0  ;;  %v498_v60 = vmul.f32 %v2013_v42, %v2013_v42  ;;  %v439_v62 = vsel %vm413_vm2, %v2013_v42, 0.0 }
  0xe1   :  { %v1451_v38 = vpop.f32.mrf.mxu0  ;;  %v537_v59 = vadd.f32 %v536_v47, %v535_v41  ;;  %v436_v61 = vadd.f32 %v435_v0, %v434_v40  ;;  %1507 = vmatprep.mubr.msk.f32.mxu1 %vm413_vm2, %v900_v24 }
  0xe2   :  { %v2023_v51 = vadd.f32 %v1451_v38, %v1864_v48  ;;  %v437_v1 = vsel %vm413_vm2, %v2017_v43, 0.0  ;;  %v497_v2 = vmul.f32 %v2017_v43, %v2017_v43  ;;  %1508 = vmatmul.mubr.msk.f32.gmra.mxu1 %vm413_vm2, %v901_v56  ;;  %v542_v12 = vsel %vm413_vm2, %v498_v60, 0.0 }
  0xe3   :  { %v324_v54 = vpop.f32.mrf.mxu0  ;;  %v438_v7 = vadd.f32 %v437_v1, %v436_v61  ;;  %v539_v9 = vadd.f32 %v538_v46, %v537_v59 }
  0xe4   :  { %v500_v10 = vmul.f32 %v2023_v51, %v2023_v51  ;;  %v2039_v11 = vadd.f32 %v1864_v48, %v324_v54  ;;  %v540_v14 = vsel %vm413_vm2, %v497_v2, 0.0  ;;  %v443_v27 = vsel %vm413_vm2, %v2023_v51, 0.0 }
  0xe5   :  { %v1454_v5 = vpop.f32.mrf.mxu0  ;;  %v541_v19 = vadd.f32 %v540_v14, %v539_v9  ;;  %v440_v20 = vadd.f32 %v439_v62, %v438_v7 }
  0xe6   :  { %v2044_v17 = vadd.f32 %v1454_v5, %v1864_v48  ;;  %v441_v25 = vsel %vm413_vm2, %v2039_v11, 0.0  ;;  %v499_v26 = vmul.f32 %v2039_v11, %v2039_v11  ;;  %v546_v30 = vsel %vm413_vm2, %v500_v10, 0.0 }
  0xe7   :  { %v334_v18 = vpop.f32.mrf.mxu0  ;;  %v442_v31 = vadd.f32 %v441_v25, %v440_v20  ;;  %v543_v33 = vadd.f32 %v542_v12, %v541_v19 }
  0xe8   :  { %v2053_v28 = vadd.f32 %v1864_v48, %v334_v18  ;;  %v544_v0 = vsel %vm413_vm2, %v499_v26, 0.0  ;;  %v502_v34 = vmul.f32 %v2044_v17, %v2044_v17  ;;  %v447_v24 = vsel %vm413_vm2, %v2044_v17, 0.0 }
  0xe9   :  { %v1457_v29 = vpop.f32.mrf.mxu0  ;;  %v545_v46 = vadd.f32 %v544_v0, %v543_v33  ;;  %v444_v47 = vadd.f32 %v443_v27, %v442_v31 }
  0xea   :  { %v445_v35 = vsel %vm413_vm2, %v2053_v28, 0.0  ;;  %v501_v38 = vmul.f32 %v2053_v28, %v2053_v28  ;;  %v2064_v40 = vadd.f32 %v1457_v29, %v1864_v48  ;;  %v550_v1 = vsel %vm413_vm2, %v502_v34, 0.0 }
  0xeb   :  { %v344_v41 = vpop.f32.mrf.mxu0  ;;  %v446_v60 = vadd.f32 %v445_v35, %v444_v47  ;;  %v547_v61 = vadd.f32 %v546_v30, %v545_v46 }
  0xec   :  { %v548_v54 = vsel %vm413_vm2, %v501_v38, 0.0  ;;  %v2070_v56 = vadd.f32 %v1864_v48, %v344_v41  ;;  %v504_v2 = vmul.f32 %v2064_v40, %v2064_v40  ;;  %v451_v14 = vsel %vm413_vm2, %v2064_v40, 0.0 }
  0xed   :  { %v1460_v59 = vpop.f32.mrf.mxu0  ;;  %v549_v10 = vadd.f32 %v548_v54, %v547_v61  ;;  %v448_v12 = vadd.f32 %v447_v24, %v446_v60 }
  0xee   :  { %v2073_v62 = vadd.f32 %v1460_v59, %v1864_v48  ;;  %v449_v5 = vsel %vm413_vm2, %v2070_v56, 0.0  ;;  %v503_v7 = vmul.f32 %v2070_v56, %v2070_v56  ;;  %v554_v29 = vsel %vm413_vm2, %v504_v2, 0.0 }
  0xef   :  { %v354_v9 = vpop.f32.mrf.mxu0  ;;  %v450_v25 = vadd.f32 %v449_v5, %v448_v12  ;;  %v551_v26 = vadd.f32 %v550_v1, %v549_v10 }
  0xf0   :  { %v552_v18 = vsel %vm413_vm2, %v503_v7, 0.0  ;;  %v2086_v19 = vadd.f32 %v1864_v48, %v354_v9  ;;  %v506_v27 = vmul.f32 %v2073_v62, %v2073_v62  ;;  %v455_v38 = vsel %vm413_vm2, %v2073_v62, 0.0 }
  0xf1   :  { %v1463_v20 = vpop.f32.mrf.mxu0  ;;  %v553_v34 = vadd.f32 %v552_v18, %v551_v26  ;;  %v452_v35 = vadd.f32 %v451_v14, %v450_v25  ;;  %v2122_v18 = vadd.f32 %v1864_v48, %v1871_v52 }
  0xf2   :  { %v453_v30 = vsel %vm413_vm2, %v2086_v19, 0.0  ;;  %v505_v31 = vmul.f32 %v2086_v19, %v2086_v19  ;;  %v2096_v33 = vadd.f32 %v1463_v20, %v1864_v48  ;;  %v558_v24 = vsel %vm413_vm2, %v506_v27, 0.0 }
  0xf3   :  { %v364_v0 = vpop.f32.mrf.mxu0  ;;  %v454_v54 = vadd.f32 %v453_v30, %v452_v35  ;;  %v555_v59 = vadd.f32 %v554_v29, %v553_v34  ;;  %v2133_v34 = vadd.f32 %v1866_v49, %v1864_v48 }
  0xf4   :  { %v556_v41 = vsel %vm413_vm2, %v505_v31, 0.0  ;;  %v2102_v46 = vadd.f32 %v1864_v48, %v364_v0  ;;  %v508_v60 = vmul.f32 %v2096_v33, %v2096_v33  ;;  %v459_v10 = vsel %vm413_vm2, %v2096_v33, 0.0 }
  0xf5   :  { %v1466_v47 = vpop.f32.mrf.mxu0  ;;  %v557_v7 = vadd.f32 %v556_v41, %v555_v59  ;;  %v456_v9 = vadd.f32 %v455_v38, %v454_v54  ;;  %v512_v49 = vmul.f32 %v2133_v34, %v2133_v34 }
  0xf6   :  { %v457_v61 = vsel %vm413_vm2, %v2102_v46, 0.0  ;;  %v507_v1 = vmul.f32 %v2102_v46, %v2102_v46  ;;  %v2112_v2 = vadd.f32 %v1466_v47, %v1864_v48  ;;  %v562_v26 = vsel %vm413_vm2, %v508_v60, 0.0 }
  0xf7   :  { %v374_v5 = vpop.f32.mrf.mxu0  ;;  %v458_v20 = vadd.f32 %v457_v61, %v456_v9  ;;  %v559_v25 = vadd.f32 %v558_v24, %v557_v7  ;;  %v511_v47 = vmul.f32 %v2122_v18, %v2122_v18  ;;  %v2142_v24 = vadd.f32 %v1864_v48, %v1890_v63 }
  0xf8   :  { %v560_v12 = vsel %vm413_vm2, %v507_v1, 0.0  ;;  %v2118_v14 = vadd.f32 %v1864_v48, %v374_v5  ;;  %v510_v27 = vmul.f32 %v2112_v2, %v2112_v2  ;;  %v463_v52 = vsel %vm413_vm2, %v2112_v2, 0.0 }
  0xf9   :  { %v561_v31 = vadd.f32 %v560_v12, %v559_v25  ;;  %v460_v0 = vadd.f32 %v459_v10, %v458_v20  ;;  %v465_v61 = vsel %vm413_vm2, %v2122_v18, 0.0  ;;  %v2151_v1 = vadd.f32 %v1880_v57, %v1864_v48 }
  0xfa   :  { %v461_v29 = vsel %vm413_vm2, %v2118_v14, 0.0  ;;  %v509_v30 = vmul.f32 %v2118_v14, %v2118_v14  ;;  %v566_v54 = vsel %vm413_vm2, %v510_v27, 0.0  ;;  %v467_v63 = vsel %vm413_vm2, %v2133_v34, 0.0 }
  0xfb   :  { %v462_v38 = vadd.f32 %v461_v29, %v460_v0  ;;  %v563_v41 = vadd.f32 %v562_v26, %v561_v31  ;;  %v568_v9 = vsel %vm413_vm2, %v511_v47, 0.0  ;;  %v513_v10 = vmul.f32 %v2142_v24, %v2142_v24 }
  0xfc   :  { %v564_v35 = vsel %vm413_vm2, %v509_v30, 0.0  ;;  %v2160_v12 = vadd.f32 %v1864_v48, %v1915_v13  ;;  %v570_v26 = vsel %vm413_vm2, %v512_v49, 0.0  ;;  %v514_v57 = vmul.f32 %v2151_v1, %v2151_v1 }
  0xfd   :  { %v464_v59 = vadd.f32 %v463_v52, %v462_v38  ;;  %v565_v60 = vadd.f32 %v564_v35, %v563_v41  ;;  %v469_v27 = vsel %vm413_vm2, %v2142_v24, 0.0  ;;  %v2169_v29 = vadd.f32 %v1904_v6, %v1864_v48 }
  0xfe   :  { %v471_v13 = vsel %vm413_vm2, %v2151_v1, 0.0  ;;  %v572_v0 = vsel %vm413_vm2, %v513_v10, 0.0  ;;  %v515_v52 = vmul.f32 %v2160_v12, %v2160_v12  ;;  %v574_v41 = vsel %vm413_vm2, %v514_v57, 0.0 }
  0xff   :  { %v466_v5 = vadd.f32 %v465_v61, %v464_v59  ;;  %v567_v7 = vadd.f32 %v566_v54, %v565_v60  ;;  %v516_v47 = vmul.f32 %v2169_v29, %v2169_v29  ;;  %v473_v48 = vsel %vm413_vm2, %v2160_v12, 0.0 }
 0x100   :  { %v475_v59 = vsel %vm413_vm2, %v2169_v29, 0.0  ;;  %v576_v60 = vsel %vm413_vm2, %v515_v52, 0.0 }
 0x101   :  { %v468_v20 = vadd.f32 %v467_v63, %v466_v5  ;;  %v569_v25 = vadd.f32 %v568_v9, %v567_v7  ;;  %v578_v5 = vsel %vm413_vm2, %v516_v47, 0.0 }
 0x103   :  { %v470_v30 = vadd.f32 %v469_v27, %v468_v20  ;;  %v571_v31 = vadd.f32 %v570_v26, %v569_v25 }
 0x105   :  { %v472_v35 = vadd.f32 %v471_v13, %v470_v30  ;;  %v573_v38 = vadd.f32 %v572_v0, %v571_v31 }
 0x107   :  { %v474_v6 = vadd.f32 %v473_v48, %v472_v35  ;;  %v575_v54 = vadd.f32 %v574_v41, %v573_v38 }
 0x109   :  { %v476_v49 = vadd.f32 %v475_v59, %v474_v6  ;;  %v577_v61 = vadd.f32 %v576_v60, %v575_v54 }
 0x10b   :  { %v477_v7 = vrot.slane %v476_v49, 4  ;;  %v579_v63 = vadd.f32 %v578_v5, %v577_v61 }
 0x10d   :  { %v478_v9 = vadd.f32 %v477_v7, %v476_v49  ;;  %v580_v10 = vrot.slane %v579_v63, 4 }
 0x10f   :  { %v479_v20 = vrot.slane %v478_v9, 2  ;;  %v581_v25 = vadd.f32 %v580_v10, %v579_v63 }
 0x111   :  { %v480_v26 = vadd.f32 %v479_v20, %v478_v9  ;;  %v582_v57 = vrot.slane %v581_v25, 2 }
 0x113   :  { %v481_v27 = vrot.slane %v480_v26, 1  ;;  %v583_v30 = vadd.f32 %v582_v57, %v581_v25 }
 0x115   :  { %v482_v31 = vadd.f32 %v481_v27, %v480_v26  ;;  %v584_v13 = vrot.slane %v583_v30, 1 }
 0x117   :  { %v2185_v0 = vmul.f32 0.00390625, %v482_v31  ;;  %v585_v35 = vadd.f32 %v584_v13, %v583_v30 }
 0x119   :  { %v586_v52 = vmul.f32 0.00390625, %v585_v35  ;;  %v587_v38 = vmul.f32 %v2185_v0, %v2185_v0  ;;  %v602_v47 = vsub.f32 %v1991_v22, %v2185_v0  ;;  %v603_v48 = vsub.f32 %v1986_v16, %v2185_v0 }
 0x11a   :  { %v604_v6 = vsub.f32 %v2017_v43, %v2185_v0  ;;  %v605_v59 = vsub.f32 %v2013_v42, %v2185_v0  ;;  %v606_v60 = vsub.f32 %v2039_v11, %v2185_v0  ;;  %v607_v49 = vsub.f32 %v2023_v51, %v2185_v0  ;;  %v1033_v51 = vld [vmem:[%s2455_s11 + $0x8] sm:$0xff] }
 0x11b   :  { %v588_v41 = vsub.f32 %v586_v52, %v587_v38  ;;  %v608_v61 = vsub.f32 %v2053_v28, %v2185_v0  ;;  %v609_v22 = vsub.f32 %v2044_v17, %v2185_v0  ;;  %v610_v16 = vsub.f32 %v2070_v56, %v2185_v0  ;;  %1514 = vmatprep.subr.mxu1 %v1033_v51 }
 0x11c   :  { %v611_v43 = vsub.f32 %v2064_v40, %v2185_v0  ;;  %v612_v42 = vsub.f32 %v2086_v19, %v2185_v0  ;;  %v619_v11 = vsub.f32 %v2133_v34, %v2185_v0  ;;  %v621_v17 = vsub.f32 %v2151_v1, %v2185_v0  ;;  %1515 = vmatpush3.msra.mxu1 %v1033_v51  ;;  %v1032_v40 = vld [vmem:[%s2455_s11] sm:$0xff] }
 0x11d   :  { %v589_v54 = vmax.f32 %v588_v41, 0.0  ;;  %v623_v28 = vsub.f32 %v2169_v29, %v2185_v0  ;;  %1516 = vmatprep.subr.mxu1 %v1032_v40  ;;  %v592_v56 = vsub.f32 %v1878_v55, %v2185_v0  ;;  %v593_v19 = vsub.f32 %v1869_v50, %v2185_v0 }
 0x11e   :  { %1517 = vmatpush3.msra.mxu1 %v1032_v40  ;;  %v594_v34 = vsub.f32 %v1902_v4, %v2185_v0  ;;  %v595_v1 = vsub.f32 %v1883_v58, %v2185_v0  ;;  %v596_v29 = vsub.f32 %v1922_v21, %v2185_v0  ;;  %v597_v7 = vsub.f32 %v1907_v8, %v2185_v0  ;;  %v1334_v40 = vld [vmem:[%s2447_s3] ss:$0 sm:$0xff] }
 0x11f   :  { %v590_v5 = vadd.f32 1e-05, %v589_v54  ;;  %v598_v63 = vsub.f32 %v1946_v39, %v2185_v0  ;;  %v599_v55 = vsub.f32 %v1925_v23, %v2185_v0  ;;  %v600_v50 = vsub.f32 %v1961_v53, %v2185_v0 }
 0x120   :  { %v601_v4 = vsub.f32 %v1954_v45, %v2185_v0  ;;  %v613_v58 = vsub.f32 %v2073_v62, %v2185_v0  ;;  %v614_v21 = vsub.f32 %v2102_v46, %v2185_v0  ;;  %v615_v8 = vsub.f32 %v2096_v33, %v2185_v0 }
 0x121   :  { %1532 = vrsqrt.f32 %v590_v5  ;;  %v616_v39 = vsub.f32 %v2118_v14, %v2185_v0  ;;  %v617_v23 = vsub.f32 %v2112_v2, %v2185_v0  ;;  %v618_v53 = vsub.f32 %v2122_v18, %v2185_v0 }
 0x122   :  { %v620_v45 = vsub.f32 %v2142_v24, %v2185_v0  ;;  %v622_v62 = vsub.f32 %v2160_v12, %v2185_v0 }
 0x12e   :  { %v1533_v9 = vpop.eup %1532 }
 0x12f   :  { %v624_v46 = vmul.f32 %v1533_v9, %v592_v56  ;;  %v625_v10 = vmul.f32 %v1533_v9, %v593_v19  ;;  %v626_v20 = vmul.f32 %v1533_v9, %v594_v34  ;;  %v627_v33 = vmul.f32 %v1533_v9, %v595_v1 }
 0x130   :  { %v628_v25 = vmul.f32 %v1533_v9, %v596_v29  ;;  %v629_v26 = vmul.f32 %v1533_v9, %v597_v7  ;;  %v630_v14 = vmul.f32 %v1533_v9, %v598_v63  ;;  %v631_v57 = vmul.f32 %v1533_v9, %v599_v55 }
 0x131   :  { %v632_v27 = vmul.f32 %v1533_v9, %v600_v50  ;;  %v633_v30 = vmul.f32 %v1533_v9, %v601_v4  ;;  %v634_v2 = vmul.f32 %v1533_v9, %v602_v47  ;;  %v635_v31 = vmul.f32 %v1533_v9, %v603_v48 }
 0x132   :  { %v636_v13 = vmul.f32 %v1533_v9, %v604_v6  ;;  %v637_v18 = vmul.f32 %v1533_v9, %v605_v59  ;;  %v638_v35 = vmul.f32 %v1533_v9, %v606_v60  ;;  %v639_v52 = vmul.f32 %v1533_v9, %v607_v49 }
 0x133   :  { %v640_v24 = vmul.f32 %v1533_v9, %v608_v61  ;;  %v641_v38 = vmul.f32 %v1533_v9, %v609_v22  ;;  %v642_v41 = vmul.f32 %v1533_v9, %v610_v16  ;;  %v643_v12 = vmul.f32 %v1533_v9, %v611_v43 }
 0x134   :  { %v644_v0 = vmul.f32 %v1533_v9, %v612_v42  ;;  %v645_v54 = vmul.f32 %v1533_v9, %v613_v58  ;;  %v646_v5 = vmul.f32 %v1533_v9, %v614_v21  ;;  %v647_v51 = vmul.f32 %v1533_v9, %v615_v8 }
 0x135   :  { %v648_v56 = vmul.f32 %v1533_v9, %v616_v39  ;;  %v649_v19 = vmul.f32 %v1533_v9, %v617_v23  ;;  %v650_v47 = vmul.f32 %v1533_v9, %v618_v53  ;;  %v651_v48 = vmul.f32 %v1533_v9, %v619_v11 }
 0x136   :  { %v652_v6 = vmul.f32 %v1533_v9, %v620_v45  ;;  %v653_v59 = vmul.f32 %v1533_v9, %v621_v17  ;;  %v654_v60 = vmul.f32 %v1533_v9, %v622_v62  ;;  %v655_v49 = vmul.f32 %v1533_v9, %v623_v28  ;;  %v1335_v62 = vld [vmem:[%s2448_s4] ss:$0 sm:$0xff] }
 0x137   :  { %v663_v61 = vmul.f32 %v1334_v40, %v624_v46  ;;  %v664_v22 = vmul.f32 %v1334_v40, %v625_v10  ;;  %v665_v16 = vmul.f32 %v1334_v40, %v626_v20  ;;  %v666_v43 = vmul.f32 %v1334_v40, %v627_v33 }
 0x138   :  { %v667_v42 = vmul.f32 %v1334_v40, %v628_v25  ;;  %v668_v34 = vmul.f32 %v1334_v40, %v629_v26  ;;  %v669_v1 = vmul.f32 %v1334_v40, %v630_v14  ;;  %v670_v29 = vmul.f32 %v1334_v40, %v631_v57 }
 0x139   :  { %v671_v7 = vmul.f32 %v1334_v40, %v632_v27  ;;  %v672_v63 = vmul.f32 %v1334_v40, %v633_v30  ;;  %v673_v55 = vmul.f32 %v1334_v40, %v634_v2  ;;  %v674_v50 = vmul.f32 %v1334_v40, %v635_v31 }
 0x13a   :  { %v675_v4 = vmul.f32 %v1334_v40, %v636_v13  ;;  %v676_v58 = vmul.f32 %v1334_v40, %v637_v18  ;;  %v677_v21 = vmul.f32 %v1334_v40, %v638_v35  ;;  %v678_v11 = vmul.f32 %v1334_v40, %v639_v52 }
 0x13b   :  { %v679_v8 = vmul.f32 %v1334_v40, %v640_v24  ;;  %v680_v17 = vmul.f32 %v1334_v40, %v641_v38  ;;  %v681_v39 = vmul.f32 %v1334_v40, %v642_v41  ;;  %v682_v28 = vmul.f32 %v1334_v40, %v643_v12 }
 0x13c   :  { %v683_v9 = vmul.f32 %v1334_v40, %v644_v0  ;;  %v684_v23 = vmul.f32 %v1334_v40, %v645_v54  ;;  %v685_v53 = vmul.f32 %v1334_v40, %v646_v5  ;;  %v686_v45 = vmul.f32 %v1334_v40, %v647_v51 }
 0x13d   :  { %v687_v46 = vmul.f32 %v1334_v40, %v648_v56  ;;  %v688_v10 = vmul.f32 %v1334_v40, %v649_v19  ;;  %v689_v20 = vmul.f32 %v1334_v40, %v650_v47  ;;  %v690_v33 = vmul.f32 %v1334_v40, %v651_v48 }
 0x13e   :  { %v691_v25 = vmul.f32 %v1334_v40, %v652_v6  ;;  %v692_v26 = vmul.f32 %v1334_v40, %v653_v59  ;;  %v693_v14 = vmul.f32 %v1334_v40, %v654_v60  ;;  %v694_v57 = vmul.f32 %v1334_v40, %v655_v49 }
 0x13f   :  { %v702_v27 = vadd.f32 %v1335_v62, %v663_v61  ;;  %v703_v30 = vadd.f32 %v1335_v62, %v664_v22  ;;  %v704_v2 = vadd.f32 %v1335_v62, %v665_v16  ;;  %v705_v31 = vadd.f32 %v1335_v62, %v666_v43 }
 0x140   :  { %v706_v13 = vadd.f32 %v1335_v62, %v667_v42  ;;  %v707_v18 = vadd.f32 %v1335_v62, %v668_v34  ;;  %v708_v35 = vadd.f32 %v1335_v62, %v669_v1  ;;  %v709_v52 = vadd.f32 %v1335_v62, %v670_v29  ;;  %v1343_v29 = vld [vmem:[%s2454_s10] ss:$0 sm:$0xff] }
 0x141   :  { %v710_v24 = vadd.f32 %v1335_v62, %v671_v7  ;;  %v711_v38 = vadd.f32 %v1335_v62, %v672_v63  ;;  %v712_v41 = vadd.f32 %v1335_v62, %v673_v55  ;;  %v713_v12 = vadd.f32 %v1335_v62, %v674_v50  ;;  %734 = vst.msk [vmem:[%s2457_s13] sm:$0xff] %vm413_vm2, %v702_v27 }
 0x142   :  { %735 = vst.msk [vmem:[%s2457_s13 + $0x8] sm:$0xff] %vm413_vm2, %v703_v30  ;;  %736 = vst.msk [vmem:[%s2457_s13 + $0x10] sm:$0xff] %vm413_vm2, %v704_v2  ;;  %v714_v0 = vadd.f32 %v1335_v62, %v675_v4  ;;  %v715_v54 = vadd.f32 %v1335_v62, %v676_v58  ;;  %v716_v5 = vadd.f32 %v1335_v62, %v677_v21  ;;  %v1161_v2 = vld [vmem:[%s2450_s6 + $0x28] sm:$0xff] }
 0x143   :  { %737 = vst.msk [vmem:[%s2457_s13 + $0x18] sm:$0xff] %vm413_vm2, %v705_v31  ;;  %v717_v51 = vadd.f32 %v1335_v62, %v678_v11  ;;  %738 = vst.msk [vmem:[%s2457_s13 + $0x20] sm:$0xff] %vm413_vm2, %v706_v13  ;;  %v718_v40 = vadd.f32 %v1335_v62, %v679_v8  ;;  %v719_v56 = vadd.f32 %v1335_v62, %v680_v17 }
 0x144   :  { %739 = vst.msk [vmem:[%s2457_s13 + $0x28] sm:$0xff] %vm413_vm2, %v707_v18  ;;  %740 = vst.msk [vmem:[%s2457_s13 + $0x30] sm:$0xff] %vm413_vm2, %v708_v35  ;;  %v720_v19 = vadd.f32 %v1335_v62, %v681_v39  ;;  %v721_v47 = vadd.f32 %v1335_v62, %v682_v28  ;;  %v722_v48 = vadd.f32 %v1335_v62, %v683_v9  ;;  %v1160_v18 = vld [vmem:[%s2450_s6 + $0x20] sm:$0xff] }
 0x145   :  { %741 = vst.msk [vmem:[%s2457_s13 + $0x38] sm:$0xff] %vm413_vm2, %v709_v52  ;;  %742 = vst.msk [vmem:[%s2457_s13 + $0x40] sm:$0xff] %vm413_vm2, %v710_v24  ;;  %v723_v6 = vadd.f32 %v1335_v62, %v684_v23  ;;  %v724_v59 = vadd.f32 %v1335_v62, %v685_v53  ;;  %v725_v60 = vadd.f32 %v1335_v62, %v686_v45  ;;  %v1167_v52 = vmax.f32 %v1161_v2, 0.0 }
 0x146   :  { %743 = vst.msk [vmem:[%s2457_s13 + $0x48] sm:$0xff] %vm413_vm2, %v711_v38  ;;  %744 = vst.msk [vmem:[%s2457_s13 + $0x50] sm:$0xff] %vm413_vm2, %v712_v41  ;;  %v726_v49 = vadd.f32 %v1335_v62, %v687_v46  ;;  %v727_v61 = vadd.f32 %v1335_v62, %v688_v10  ;;  %v728_v22 = vadd.f32 %v1335_v62, %v689_v20  ;;  %v1157_v10 = vld [vmem:[%s2450_s6 + $0x8] sm:$0xff]  ;;  %v1156_v20 = vld [vmem:[%s2450_s6] sm:$0xff]  ;;  %v1166_v41 = vmax.f32 %v1160_v18, 0.0 }
 0x147   :  { %745 = vst.msk [vmem:[%s2457_s13 + $0x58] sm:$0xff] %vm413_vm2, %v713_v12  ;;  %746 = vst.msk [vmem:[%s2457_s13 + $0x60] sm:$0xff] %vm413_vm2, %v714_v0  ;;  %v729_v16 = vadd.f32 %v1335_v62, %v690_v33  ;;  %v730_v43 = vadd.f32 %v1335_v62, %v691_v25  ;;  %v731_v42 = vadd.f32 %v1335_v62, %v692_v26  ;;  %v1163_v33 = vmax.f32 %v1157_v10, 0.0  ;;  %v1159_v26 = vld [vmem:[%s2450_s6 + $0x18] sm:$0xff] }
 0x148   :  { %747 = vst.msk [vmem:[%s2457_s13 + $0x68] sm:$0xff] %vm413_vm2, %v715_v54  ;;  %748 = vst.msk [vmem:[%s2457_s13 + $0x70] sm:$0xff] %vm413_vm2, %v716_v5  ;;  %v732_v34 = vadd.f32 %v1335_v62, %v693_v14  ;;  %v733_v1 = vadd.f32 %v1335_v62, %v694_v57  ;;  %v1162_v25 = vmax.f32 %v1156_v20, 0.0  ;;  %v1158_v57 = vld [vmem:[%s2450_s6 + $0x10] sm:$0xff]  ;;  %v1165_v27 = vmax.f32 %v1159_v26, 0.0 }
 0x149   :  { %749 = vst.msk [vmem:[%s2457_s13 + $0x78] sm:$0xff] %vm413_vm2, %v717_v51  ;;  %750 = vst.msk [vmem:[%s2457_s13 + $0x80] sm:$0xff] %vm413_vm2, %v718_v40  ;;  %v1169_v14 = vmin.f32 %v1163_v33, 1.0  ;;  %v1164_v31 = vmax.f32 %v1158_v57, 0.0  ;;  %v1173_v54 = vmin.f32 %v1167_v52, 1.0  ;;  %v1172_v40 = vmin.f32 %v1166_v41, 1.0 }
 0x14a   :  { %751 = vst.msk [vmem:[%s2457_s13 + $0x88] sm:$0xff] %vm413_vm2, %v719_v56  ;;  %752 = vst.msk [vmem:[%s2457_s13 + $0x90] sm:$0xff] %vm413_vm2, %v720_v19  ;;  %v1168_v30 = vmin.f32 %v1162_v25, 1.0  ;;  %v1171_v35 = vmin.f32 %v1165_v27, 1.0 }
 0x14b   :  { %753 = vst.msk [vmem:[%s2457_s13 + $0x98] sm:$0xff] %vm413_vm2, %v721_v47  ;;  %754 = vst.msk [vmem:[%s2457_s13 + $0xa0] sm:$0xff] %vm413_vm2, %v722_v48  ;;  %v1181_v13 = vsub.f32 1.0, %v1169_v14  ;;  %v1170_v38 = vmin.f32 %v1164_v31, 1.0  ;;  %v1185_v19 = vsub.f32 1.0, %v1173_v54  ;;  %v1184_v48 = vsub.f32 1.0, %v1172_v40 }
 0x14c   :  { %755 = vst.msk [vmem:[%s2457_s13 + $0xa8] sm:$0xff] %vm413_vm2, %v723_v6  ;;  %756 = vst.msk [vmem:[%s2457_s13 + $0xb0] sm:$0xff] %vm413_vm2, %v724_v59  ;;  %v1180_v24 = vsub.f32 1.0, %v1168_v30  ;;  %v1183_v0 = vsub.f32 1.0, %v1171_v35 }
 0x14d   :  { %757 = vst.msk [vmem:[%s2457_s13 + $0xb8] sm:$0xff] %vm413_vm2, %v725_v60  ;;  %758 = vst.msk [vmem:[%s2457_s13 + $0xc0] sm:$0xff] %vm413_vm2, %v726_v49  ;;  %v1187_v12 = vmax.f32 %v1181_v13, 1e-05  ;;  %v1182_v51 = vsub.f32 1.0, %v1170_v38 }
 0x14e   :  { %759 = vst.msk [vmem:[%s2457_s13 + $0xc8] sm:$0xff] %vm413_vm2, %v727_v61  ;;  %760 = vst.msk [vmem:[%s2457_s13 + $0xd0] sm:$0xff] %vm413_vm2, %v728_v22  ;;  %v1186_v5 = vmax.f32 %v1180_v24, 1e-05  ;;  %v1189_v56 = vmax.f32 %v1183_v0, 1e-05 }
 0x14f   :  { %761 = vst.msk [vmem:[%s2457_s13 + $0xd8] sm:$0xff] %vm413_vm2, %v729_v16  ;;  %762 = vst.msk [vmem:[%s2457_s13 + $0xe0] sm:$0xff] %vm413_vm2, %v730_v43  ;;  %1534 = vrcp.f32 %v1187_v12  ;;  %v1188_v47 = vmax.f32 %v1182_v51, 1e-05  ;;  %v1191_v6 = vmax.f32 %v1185_v19, 1e-05 }
 0x150   :  { %763 = vst.msk [vmem:[%s2457_s13 + $0xe8] sm:$0xff] %vm413_vm2, %v731_v42  ;;  %764 = vst.msk [vmem:[%s2457_s13 + $0xf0] sm:$0xff] %vm413_vm2, %v732_v34  ;;  %1536 = vrcp.f32 %v1186_v5  ;;  %v1190_v59 = vmax.f32 %v1184_v48, 1e-05  ;;  %v1175_v60 = vmax.f32 %v1169_v14, 1e-05 }
 0x151   :  { %765 = vst.msk [vmem:[%s2457_s13 + $0xf8] sm:$0xff] %vm413_vm2, %v733_v1  ;;  %1538 = vrcp.f32 %v1189_v56  ;;  %v1174_v61 = vmax.f32 %v1168_v30, 1e-05  ;;  %v1177_v43 = vmax.f32 %v1171_v35, 1e-05 }
 0x152   :  { %1540 = vrcp.f32 %v1188_v47  ;;  %v1176_v1 = vmax.f32 %v1170_v38, 1e-05 }
 0x153   :  { %1542 = vrcp.f32 %v1191_v6 }
 0x154   :  { %1544 = vrcp.f32 %v1190_v59 }
 0x15c   :  { %v1535_v49 = vpop.eup %1534 }
 0x15d   :  { %v1537_v22 = vpop.eup %1536  ;;  %v1195_v16 = vmul.f32 %v1535_v49, %v1175_v60 }
 0x15e   :  { %v1539_v42 = vpop.eup %1538  ;;  %v1193_v34 = vmul.f32 %v1537_v22, %v1174_v61  ;;  %v1258_v61 = vlaneseq }
 0x15f   :  { %1546 = vlog2.f32 %v1195_v16 }
 0x160   :  { %1548 = vlog2.f32 %v1193_v34  ;;  %v1259_v34 = vand.u32 127, %v1258_v61 }
 0x162   :  { %vm1261_vm3 = vcmp.lt.s32.totalorder %v1259_v34, 32  ;;  %vm1260_vm4 = vcmp.lt.s32.totalorder %v1259_v34, 4 }
 0x19a   :  { %v1503_v7 = vpop.f32.mrf.mxu1 }
 0x19b   :  { %v1003_v63 = vadd.f32 %v1503_v7, %v1343_v29  ;;  %v1199_v7 = vmul.f32 %v1539_v42, %v1177_v43 }
 0x19c   :  { %v997_v55 = vpop.f32.mrf.mxu1 }
 0x19d   :  { %v998_v50 = vadd.f32 %v1343_v29, %v997_v55  ;;  %v1027_v21 = vmax.f32 %v1003_v63, 0.0  ;;  %v1179_v63 = vmax.f32 %v1173_v54, 1e-05  ;;  %1550 = vlog2.f32 %v1199_v7 }
 0x19e   :  { %v1506_v58 = vpop.f32.mrf.mxu1 }
 0x19f   :  { %v1026_v4 = vmax.f32 %v998_v50, 0.0  ;;  %v1013_v11 = vadd.f32 %v1506_v58, %v1343_v29 }
 0x1a0   :  { %v1007_v8 = vpop.f32.mrf.mxu1 }
 0x1a1   :  { %1518 = vmatprep.mubr.msk.f32.mxu1 %vm413_vm2, %v1026_v4  ;;  %v1008_v17 = vadd.f32 %v1343_v29, %v1007_v8  ;;  %v1029_v9 = vmax.f32 %v1013_v11, 0.0  ;;  %v1178_v4 = vmax.f32 %v1172_v40, 1e-05 }
 0x1a2   :  { %1519 = vmatmul.mubr.msk.f32.vlgmr.msra.gmra.mxu1 %vm413_vm2, %v1027_v21  ;;  %v1509_v39 = vpop.f32.mrf.mxu1 }
 0x1a3   :  { %v1028_v28 = vmax.f32 %v1008_v17, 0.0  ;;  %v1023_v23 = vadd.f32 %v1509_v39, %v1343_v29  ;;  %v1350_v39 = vld [vmem:[%s2456_s12] ss:$0 sm:$0xff]  ;;  %s1604_s12 = smov [#allocation2]  }
 0x1a4   :  { %v1017_v53 = vpop.f32.mrf.mxu1  ;;  %s1287_s23 = sshll.u32 %s1604_s12, 4  ;;  %s1288_s23 = int_to_ptr.vmem [resolvable:$true] %s1287_s23 }
 0x1a5   :  { %v1018_v45 = vadd.f32 %v1343_v29, %v1017_v53  ;;  %1521 = vmatprep.mubr.msk.f32.mxu1 %vm413_vm2, %v1028_v28  ;;  %v1031_v46 = vmax.f32 %v1023_v23, 0.0  ;;  %v1541_v29 = vpop.eup %1540  ;;  %s1582_s4 = scalar_lea.vmem %s1288_s23, 768  ;;  %p1587_p1 = scmp.lt.s32.totalorder %s1288_s23, %s1288_s23 }
 0x1a6   :  { %1522 = vmatmul.mubr.msk.f32.gmra.mxu1 %vm413_vm2, %v1029_v9  ;;  %v1543_v55 = vpop.eup %1542  ;;  %v1197_v50 = vmul.f32 %v1541_v29, %v1176_v1  ;;  %p1583_p0 = scmp.ne.s32.totalorder %s1288_s23, %s1582_s4  ;;  %p1588_p2 = scmp.lt.s32.totalorder %s1582_s4, %s1582_s4 }
 0x1a7   :  { %v1030_v62 = vmax.f32 %v1018_v45, 0.0  ;;  %v1545_v58 = vpop.eup %1544  ;;  %v1203_v21 = vmul.f32 %v1543_v55, %v1179_v63  ;;  %v1263_v55 = vsel %vm1261_vm3, 0.0, %v1941_v36  ;;  %v1264_v36 = vsel %vm1261_vm3, 0.0, %v1983_v15 }
 0x1a8   :  { %1552 = vlog2.f32 %v1197_v50  ;;  %v1201_v11 = vmul.f32 %v1545_v58, %v1178_v4  ;;  %v1547_v8 = vpop.eup %1546  ;;  %v1262_v58 = vsel %vm1261_vm3, 0.0, %v1951_v44  ;;  %p1589_p3 = por %p1588_p2, %p1587_p1 }
 0x1a9   :  { %1524 = vmatprep.mubr.msk.f32.mxu1 %vm413_vm2, %v1030_v62  ;;  %1554 = vlog2.f32 %v1203_v21  ;;  %v1549_v17 = vpop.eup %1548  ;;  %v1207_v28 = vmul.f32 0.6931472, %v1547_v8  ;;  %v1265_v8 = vsel %vm1261_vm3, 0.0, %v1970_v3  ;;  %v1266_v3 = vsel %vm1261_vm3, 0.0, %v2009_v37 }
 0x1aa   :  { %1525 = vmatmul.mubr.msk.f32.gmra.mxu1 %vm413_vm2, %v1031_v46  ;;  %1556 = vlog2.f32 %v1201_v11  ;;  %v1551_v23 = vpop.eup %1550  ;;  %v1205_v45 = vmul.f32 0.6931472, %v1549_v17  ;;  %p1590_p4 = pnand %p1589_p3, %p1583_p0 }
 0x1ab   :  { %v1211_v33 = vmul.f32 0.6931472, %v1551_v23 }
 0x1b5   :  { %v1553_v46 = vpop.eup %1552 }
 0x1b6   :  { %v1555_v25 = vpop.eup %1554  ;;  %v1209_v30 = vmul.f32 0.6931472, %v1553_v46 }
 0x1b7   :  { %v1557_v2 = vpop.eup %1556  ;;  %v1215_v52 = vmul.f32 0.6931472, %v1555_v25 }
 0x1b8   :  { %v1213_v0 = vmul.f32 0.6931472, %v1557_v2 }
 0x262   :  { %v1520_v9 = vpop.f32.mrf.mxu1 }
 0x263   :  { %v1133_v53 = vadd.f32 %v1520_v9, %v1350_v39  ;;  %v1267_v9 = vsel %vm1261_vm3, 0.0, %v2000_v32 }
 0x264   :  { %v1127_v62 = vpop.f32.mrf.mxu1 }
 0x265   :  { %v1217_v10 = vadd.f32 %v1207_v28, %v1133_v53  ;;  %v1128_v20 = vadd.f32 %v1350_v39, %v1127_v62 }
 0x266   :  { %v1523_v57 = vpop.f32.mrf.mxu1 }
 0x267   :  { %v1358_v26 = vmul.f32 -1.442695, %v1217_v10  ;;  %v1216_v14 = vadd.f32 %v1205_v45, %v1128_v20  ;;  %v1143_v27 = vadd.f32 %v1523_v57, %v1350_v39 }
 0x268   :  { %v1137_v13 = vpop.f32.mrf.mxu1 }
 0x269   :  { %1558 = vpow2.f32 %v1358_v26  ;;  %v1357_v31 = vmul.f32 -1.442695, %v1216_v14  ;;  %v1219_v18 = vadd.f32 %v1211_v33, %v1143_v27  ;;  %v1138_v35 = vadd.f32 %v1350_v39, %v1137_v13 }
 0x26a   :  { %v1526_v24 = vpop.f32.mrf.mxu1 }
 0x26b   :  { %1560 = vpow2.f32 %v1357_v31  ;;  %v1360_v38 = vmul.f32 -1.442695, %v1219_v18  ;;  %v1218_v41 = vadd.f32 %v1209_v30, %v1138_v35  ;;  %v1153_v12 = vadd.f32 %v1526_v24, %v1350_v39 }
 0x26c   :  { %v1147_v54 = vpop.f32.mrf.mxu1 }
 0x26d   :  { %1562 = vpow2.f32 %v1360_v38  ;;  %v1359_v5 = vmul.f32 -1.442695, %v1218_v41  ;;  %v1221_v51 = vadd.f32 %v1215_v52, %v1153_v12  ;;  %v1148_v40 = vadd.f32 %v1350_v39, %v1147_v54 }
 0x26f   :  { %1564 = vpow2.f32 %v1359_v5  ;;  %v1362_v56 = vmul.f32 -1.442695, %v1221_v51  ;;  %v1220_v19 = vadd.f32 %v1213_v0, %v1148_v40 }
 0x271   :  { %1566 = vpow2.f32 %v1362_v56  ;;  %v1361_v47 = vmul.f32 -1.442695, %v1220_v19 }
 0x273   :  { %1568 = vpow2.f32 %v1361_v47 }
 0x276   :  { %v1559_v48 = vpop.eup %1558 }
 0x277   :  { %v1241_v6 = vadd.f32 1.0, %v1559_v48 }
 0x278   :  { %v1561_v59 = vpop.eup %1560 }
 0x279   :  { %1570 = vrcp.f32 %v1241_v6  ;;  %v1240_v60 = vadd.f32 1.0, %v1561_v59 }
 0x27a   :  { %v1563_v49 = vpop.eup %1562 }
 0x27b   :  { %1572 = vrcp.f32 %v1240_v60  ;;  %v1243_v22 = vadd.f32 1.0, %v1563_v49 }
 0x27c   :  { %v1565_v16 = vpop.eup %1564 }
 0x27d   :  { %1574 = vrcp.f32 %v1243_v22  ;;  %v1242_v43 = vadd.f32 1.0, %v1565_v16 }
 0x27e   :  { %v1567_v42 = vpop.eup %1566 }
 0x27f   :  { %1576 = vrcp.f32 %v1242_v43  ;;  %v1245_v1 = vadd.f32 1.0, %v1567_v42 }
 0x280   :  { %v1569_v29 = vpop.eup %1568 }
 0x281   :  { %1578 = vrcp.f32 %v1245_v1  ;;  %v1244_v7 = vadd.f32 1.0, %v1569_v29 }
 0x283   :  { %1580 = vrcp.f32 %v1244_v7 }
 0x286   :  { %v1571_v63 = vpop.eup %1570 }
 0x287   :  { %v1269_v50 = vsel %vm1260_vm4, %v1571_v63, %v1263_v55 }
 0x288   :  { %v1573_v4 = vpop.eup %1572  ;;  %1275 = vst [vmem:[#allocation2 + $0x8] sm:$0xff] %v1269_v50 }
 0x289   :  { %v1268_v21 = vsel %vm1260_vm4, %v1573_v4, %v1262_v58 }
 0x28a   :  { %1274 = vst [vmem:[#allocation2] sm:$0xff] %v1268_v21  ;;  %v1575_v11 = vpop.eup %1574 }
 0x28b   :  { %v1271_v17 = vsel %vm1260_vm4, %v1575_v11, %v1265_v8 }
 0x28c   :  { %v1577_v39 = vpop.eup %1576  ;;  %1277 = vst [vmem:[#allocation2 + $0x18] sm:$0xff] %v1271_v17 }
 0x28d   :  { %v1270_v28 = vsel %vm1260_vm4, %v1577_v39, %v1264_v36 }
 0x28e   :  { %v1579_v44 = vpop.eup %1578  ;;  %1276 = vst [vmem:[#allocation2 + $0x10] sm:$0xff] %v1270_v28 }
 0x28f   :  { %v1273_v23 = vsel %vm1260_vm4, %v1579_v44, %v1267_v9 }
 0x290   :  { %v1581_v53 = vpop.eup %1580  ;;  %1279 = vst [vmem:[#allocation2 + $0x28] sm:$0xff] %v1273_v23 }
 0x291   :  { %v1272_v15 = vsel %vm1260_vm4, %v1581_v53, %v1266_v3 }
 0x292   :  { %1278 = vst [vmem:[#allocation2 + $0x20] sm:$0xff] %v1272_v15 }
 0x293   :  { %1593 = shalt.err (!%p1590_p4)
}
 0x294   :  { %s1605_s24 = smov 128   ;;  %s1606_s25 = smov 8  }
 0x295   :  { %1293 = dma.vmem_to_hbm [thread:$0]  %s1288_s23, 768, %s2458_s14, [#allocation3], %s1605_s24, %s1605_s24, %s1606_s25  }
 0x296   :  { %1602 = dma.done.wait [#allocation3], 768  }
 0x297   :  { %1603 = vsyncadd [#allocation3], 4294966528 }
 0x298   :  { %1299 = vsyncpa [#allocation3], 1 }

</bundles_post_ra>
